<compile_context>
chip_gen: v7x
topology: tpu7x:2x2x1
jax: 0.10.0
libtpu: 0.0.40
codegen_flags: <defaults>
</compile_context>

<pallas_src>
import functools
import itertools

import numpy as np
import jax
import jax.numpy as jnp
from jax.experimental import pallas as pl
from jax.experimental.pallas import tpu as pltpu

LARGE_PRIMES = (1, 19349663, 83492791, 48397621)

_VMEM_SOFT_CAP = 48 * 2 ** 20       # leaves headroom inside v7x's 64 MiB VMEM


def _mod_n_entries(x, n_entries):
    # Operands are non-negative under the documented [0, 1) input contract;
    # for power-of-two table sizes the modulo is a cheap AND (and matches the
    # int64 reference bit-exactly even under int32 wraparound).
    if n_entries & (n_entries - 1) == 0:
        return jnp.bitwise_and(x, jnp.int32(n_entries - 1))
    return x % jnp.int32(n_entries)


def _tile_vmem_bytes(tile_b, n_feat_pad, n_entries_pad, entry_chunk, n_corners):
    """Rough per-tile VMEM footprint (bytes) used for tile sizing / vmem limit."""
    words = (
        2 * 8 * tile_b                          # position block (sublane-padded), x2 buffers
        + 2 * n_feat_pad * tile_b               # output block, x2 buffers
        + n_feat_pad * max(n_entries_pad, 128)  # hash table, single resident copy
        + 8 * 8 * tile_b                        # q / lower / frac / coefficient rows
        + 3 * n_corners * tile_b                # per-corner hash & weight rows (+spill)
        + 4 * entry_chunk * tile_b              # chunk one-hot / iota / compare temporaries
        + 2 * n_feat_pad * tile_b               # per-chunk matmul partial + accumulator
    )
    return 4 * words


def _hashed_interp_kernel(inv_gs_ref, q_ref, table_ref, out_ref, *,
                          n_dim, n_entries, entry_chunk, bit_table):
    q = q_ref[...]                        # (n_dim, TILE_B) f32 == position * grids
    tile_b = q.shape[-1]
    n_entries_pad = table_ref.shape[-1]

    # ---- whole-block grid math (one pass over all dims at once) ----------
    lower_f = jnp.floor(q)                # findGrid
    lower_i = lower_f.astype(jnp.int32)
    frac = q - lower_f                    # == (position - lower/grid) * grid
    one_minus = 1.0 - frac                # == ((lower+1)/grid - position) * grid

    # ---- per-dimension rows, hoisted out of the corner loop --------------
    coef = []     # coef[d][bit]  : (1, TILE_B) f32 interpolation coefficient
    hparts = []   # hparts[d][bit]: (1, TILE_B) i32, (lower + bit) * prime_d
    for d in range(n_dim):
        inv_gs = inv_gs_ref[d]            # SMEM scalar: 1 / (grid_d * size_d)
        coef.append((frac[d:d + 1, :] * inv_gs,        # bit == 0
                     one_minus[d:d + 1, :] * inv_gs))  # bit == 1
        li = lower_i[d:d + 1, :]
        prime = LARGE_PRIMES[d]
        hp0 = li if prime == 1 else li * jnp.int32(prime)   # skip *1 for dim 0
        hparts.append((hp0, hp0 + jnp.int32(prime)))

    # ---- per-corner hash + weight (2**n_dim rows, reused by every chunk) --
    corners = []
    for bits in bit_table:
        h = _mod_n_entries(jnp.bitwise_xor(hparts[0][bits[0]],
                                           hparts[1][bits[1]]), n_entries)
        w = coef[0][bits[0]] * coef[1][bits[1]]
        for d in range(2, n_dim):
            h = _mod_n_entries(jnp.bitwise_xor(h, hparts[d][bits[d]]), n_entries)
            w = w * coef[d][bits[d]]
        corners.append((h, w))            # each (1, TILE_B)

    # ---- entry-chunked weighted one-hot + per-chunk MXU accumulate --------
    # For each chunk of entries the accumulator stays register-resident for
    # the whole corner loop (one materialisation per chunk, not per corner);
    # hash collisions add up exactly like the reference's gathered-value sum.
    base_iota = jax.lax.broadcasted_iota(jnp.int32, (entry_chunk, tile_b), 0)
    out_acc = None
    for e0 in range(0, n_entries_pad, entry_chunk):
        oh = None
        for h, w in corners:
            h_local = h if e0 == 0 else h - jnp.int32(e0)
            eq = base_iota == h_local                              # (chunk, TILE_B)
            oh = jnp.where(eq, w, 0.0) if oh is None else jnp.where(eq, oh + w, oh)
        part = jnp.dot(table_ref[:, e0:e0 + entry_chunk], oh,
                       preferred_element_type=jnp.float32)         # (F_pad, TILE_B)
        out_acc = part if out_acc is None else out_acc + part
    out_ref[...] = out_acc                                         # lane-dense store


def hashed_interpolator_forward(position, hash_table, grids, *,
                                tile_b=512, entry_chunk=16):
    """Pallas forward of HashedInterpolator.  position: (B, n_dim) in [0, 1)."""
    B, n_dim = position.shape
    n_entries, n_feature = hash_table.shape
    assert 2 <= n_dim <= len(LARGE_PRIMES)
    grids_t = tuple(float(g) for g in grids)
    bit_table = tuple(itertools.product((0, 1), repeat=n_dim))
    n_corners = len(bit_table)

    # int32 hashing matches the int64 reference exactly for power-of-two
    # n_entries; otherwise the corner*prime products must fit in int32.
    if n_entries & (n_entries - 1) != 0:
        assert (max(grids_t) + 1.0) * max(LARGE_PRIMES[:n_dim]) < 2 ** 31, (
            "int32 hashing would overflow for this grid size / non-power-of-two "
            "n_entries combination")

    n_feat_pad = ((n_feature + 7) // 8) * 8              # sublane-aligned output rows
    entry_chunk = max(8, (min(entry_chunk, n_entries + 7) // 8) * 8)
    n_entries_pad = pl.cdiv(n_entries, entry_chunk) * entry_chunk

    # --- batch tile selection (lane-multiple, >=2 tiles, VMEM soft cap) ----
    tile_b = max(128, (min(tile_b, max(B, 128)) // 128) * 128)
    if B > 128 and pl.cdiv(B, tile_b) < 2:
        # keep >= 2 grid tiles so the "parallel" axis can feed both v7x cores
        tile_b = max(128, ((((B + 1) // 2) + 127) // 128) * 128)
    while tile_b > 128 and _tile_vmem_bytes(tile_b, n_feat_pad, n_entries_pad,
                                            entry_chunk, n_corners) > _VMEM_SOFT_CAP:
        tile_b -= 128
    num_tiles = pl.cdiv(B, tile_b)
    b_pad = num_tiles * tile_b

    # PyTorch quirk: the cell size is taken from batch row 0 of (upper-lower).
    # Pass 1/(grid_d * size_d) to every tile via SMEM so batch tiling keeps
    # the exact semantics.
    grids_arr = jnp.asarray(grids_t, jnp.float32)
    lower0 = jnp.floor(position[0].astype(jnp.float32) * grids_arr)
    size0 = (lower0 + 1.0) / grids_arr - lower0 / grids_arr
    inv_gs = (1.0 / (grids_arr * size0)).astype(jnp.float32)       # (n_dim,) -> SMEM

    # Lane-dense, pre-scaled position block (n_dim, B_pad).  Zero padding
    # keeps the extra lanes on well-defined values (position 0).
    pos_pad = jnp.zeros((b_pad, n_dim), jnp.float32).at[:B].set(
        position.astype(jnp.float32))
    q_t = (pos_pad * grids_arr).T                                  # (n_dim, B_pad)

    # Transposed, feature/entry-padded hash table (single resident VMEM copy).
    table_t = jnp.zeros((n_feat_pad, n_entries_pad), jnp.float32)
    table_t = table_t.at[:n_feature, :n_entries].set(
        hash_table.T.astype(jnp.float32))

    vmem_need = _tile_vmem_bytes(tile_b, n_feat_pad, n_entries_pad,
                                 entry_chunk, n_corners)
    vmem_limit = int(min(100 * 2 ** 20, max(32 * 2 ** 20, 2 * vmem_need)))

    kernel = functools.partial(
        _hashed_interp_kernel, n_dim=n_dim, n_entries=n_entries,
        entry_chunk=entry_chunk, bit_table=bit_table)

    out_t = pl.pallas_call(
        kernel,
        out_shape=jax.ShapeDtypeStruct((n_feat_pad, b_pad), jnp.float32),
        grid=(num_tiles,),
        in_specs=[
            # row-0 cell-size reciprocals: tiny, scalar-indexed -> SMEM
            pl.BlockSpec(memory_space=pltpu.MemorySpace.SMEM),
            # position * grids, transposed, tiled along the batch (lane) axis
            pl.BlockSpec((n_dim, tile_b), lambda i: (0, i)),
            # hash table: whole-array VMEM operand (one resident copy, not
            # double-buffered -- its block never changes across the grid)
            pl.BlockSpec(memory_space=pltpu.MemorySpace.VMEM),
        ],
        out_specs=pl.BlockSpec((n_feat_pad, tile_b), lambda i: (0, i)),
        compiler_params=pltpu.CompilerParams(
            dimension_semantics=("parallel",),
            vmem_limit_bytes=vmem_limit),
    )(inv_gs, q_t, table_t)

    return out_t[:n_feature, :B].T                                 # (B, n_feature)


def reference_forward(position, hash_table, grids):
    """Pure-JAX reference mirroring the PyTorch module exactly."""
    B, n_dim = position.shape
    n_entries, n_feature = hash_table.shape
    bit_table = jnp.array(list(itertools.product((0, 1), repeat=n_dim)),
                          jnp.int32)
    index_list = jnp.tile(jnp.arange(n_dim)[None, :], (2 ** n_dim, 1))
    primes = jnp.array(LARGE_PRIMES[:n_dim], jnp.int32)
    grids_f = jnp.asarray(grids, jnp.float32)

    lower = jnp.floor(position * grids_f).astype(jnp.int32)            # (B, d)
    corner = lower[:, None, :] + bit_table[None]                       # (B, 2^d, d)
    h = jnp.bitwise_xor(corner[..., 0] * primes[0],
                        corner[..., 1] * primes[1]) % n_entries
    for i in range(2, n_dim):
        h = jnp.bitwise_xor(h, corner[..., i] * primes[i]) % n_entries
    corner_value = hash_table[h]                                       # (B, 2^d, F)

    lower_f = lower.astype(jnp.float32)
    lower_limit = lower_f / grids_f
    upper_limit = (lower_f + 1.0) / grids_f
    size = (upper_limit - lower_limit)[0]
    coef = jnp.stack([(position - lower_limit) / size,
                      (upper_limit - position) / size], axis=-1)       # (B, d, 2)
    w = jnp.prod(coef[:, index_list, bit_table], axis=2)               # (B, 2^d)
    return jnp.sum(corner_value * w[..., None], axis=1)                # (B, F)


if __name__ == "__main__":
    B, n_dim, n_entries, n_feature = 1024, 3, 64, 4
    grids = (16, 16, 16)

    key = jax.random.PRNGKey(0)
    k_pos, k_tab = jax.random.split(key)
    position = jax.random.uniform(k_pos, (B, n_dim), jnp.float32)
    # deterministic init matching (rand - 0.5) * 2e-4
    hash_table = (jax.random.uniform(k_tab, (n_entries, n_feature),
                                     jnp.float32) - 0.5) * 0.0002

    out = hashed_interpolator_forward(position, hash_table, grids)
    out = jax.block_until_ready(out)
    assert out.shape == (B, n_feature)

    ref = reference_forward(position, hash_table, grids)
    np.testing.assert_allclose(np.asarray(out), np.asarray(ref),
                               rtol=1e-5, atol=1e-8)

    print("KERNEL_OK")
</pallas_src>

<mosaic_0001>
module attributes {stable_mosaic.version = 11 : i64} {
  func.func @_hashed_interp_kernel(%arg0: i32, %arg1: memref<3xf32, #tpu.memory_space<smem>>, %arg2: memref<3x512xf32, #tpu.memory_space<vmem>>, %arg3: memref<8x64xf32, #tpu.memory_space<vmem>>, %arg4: memref<8x512xf32, #tpu.memory_space<vmem>>) attributes {dimension_semantics = [#tpu.dimension_semantics<parallel>], iteration_bounds = array<i64: 2>, scalar_prefetch = 0 : i64, scratch_operands = 0 : i64, tpu.core_type = #tpu.core_type<tc>, window_params = [{transform_indices = @transform_0, window_bounds = array<i64: 3>}, {transform_indices = @transform_1, window_bounds = array<i64: 3, 512>}, {pipeline_mode = #tpu.pipeline_mode<synchronous>, transform_indices = @transform_2, window_bounds = array<i64: 8, 64>}, {transform_indices = @transform_3, window_bounds = array<i64: 8, 512>}]} {
    %c0 = arith.constant 0 : index
    %c0_0 = arith.constant 0 : index
    %0 = vector.load %arg2[%c0, %c0_0] : memref<3x512xf32, #tpu.memory_space<vmem>>, vector<3x512xf32>
    %1 = math.floor %0 : vector<3x512xf32>
    %2 = arith.fptosi %1 : vector<3x512xf32> to vector<3x512xi32>
    %3 = arith.subf %0, %1 : vector<3x512xf32>
    %cst = arith.constant 1.000000e+00 : f32
    %4 = vector.broadcast %cst : f32 to vector<3x512xf32>
    %5 = arith.subf %4, %3 : vector<3x512xf32>
    %c0_1 = arith.constant 0 : index
    %6 = memref.load %arg1[%c0_1] : memref<3xf32, #tpu.memory_space<smem>>
    %7 = vector.extract_strided_slice %3 {offsets = [0, 0], sizes = [1, 512], strides = [1, 1]} : vector<3x512xf32> to vector<1x512xf32>
    %8 = vector.broadcast %6 : f32 to vector<1x512xf32>
    %9 = arith.mulf %7, %8 : vector<1x512xf32>
    %10 = vector.extract_strided_slice %5 {offsets = [0, 0], sizes = [1, 512], strides = [1, 1]} : vector<3x512xf32> to vector<1x512xf32>
    %11 = vector.broadcast %6 : f32 to vector<1x512xf32>
    %12 = arith.mulf %10, %11 : vector<1x512xf32>
    %13 = vector.extract_strided_slice %2 {offsets = [0, 0], sizes = [1, 512], strides = [1, 1]} : vector<3x512xi32> to vector<1x512xi32>
    %c1_i32 = arith.constant 1 : i32
    %14 = vector.broadcast %c1_i32 : i32 to vector<1x512xi32>
    %15 = arith.addi %13, %14 : vector<1x512xi32>
    %c1 = arith.constant 1 : index
    %16 = memref.load %arg1[%c1] : memref<3xf32, #tpu.memory_space<smem>>
    %17 = vector.extract_strided_slice %3 {offsets = [1, 0], sizes = [1, 512], strides = [1, 1]} : vector<3x512xf32> to vector<1x512xf32>
    %18 = vector.broadcast %16 : f32 to vector<1x512xf32>
    %19 = arith.mulf %17, %18 : vector<1x512xf32>
    %20 = vector.extract_strided_slice %5 {offsets = [1, 0], sizes = [1, 512], strides = [1, 1]} : vector<3x512xf32> to vector<1x512xf32>
    %21 = vector.broadcast %16 : f32 to vector<1x512xf32>
    %22 = arith.mulf %20, %21 : vector<1x512xf32>
    %23 = vector.extract_strided_slice %2 {offsets = [1, 0], sizes = [1, 512], strides = [1, 1]} : vector<3x512xi32> to vector<1x512xi32>
    %c19349663_i32 = arith.constant 19349663 : i32
    %24 = vector.broadcast %c19349663_i32 : i32 to vector<1x512xi32>
    %25 = arith.muli %23, %24 : vector<1x512xi32>
    %c19349663_i32_2 = arith.constant 19349663 : i32
    %26 = vector.broadcast %c19349663_i32_2 : i32 to vector<1x512xi32>
    %27 = arith.addi %25, %26 : vector<1x512xi32>
    %c2 = arith.constant 2 : index
    %28 = memref.load %arg1[%c2] : memref<3xf32, #tpu.memory_space<smem>>
    %29 = vector.extract_strided_slice %3 {offsets = [2, 0], sizes = [1, 512], strides = [1, 1]} : vector<3x512xf32> to vector<1x512xf32>
    %30 = vector.broadcast %28 : f32 to vector<1x512xf32>
    %31 = arith.mulf %29, %30 : vector<1x512xf32>
    %32 = vector.extract_strided_slice %5 {offsets = [2, 0], sizes = [1, 512], strides = [1, 1]} : vector<3x512xf32> to vector<1x512xf32>
    %33 = vector.broadcast %28 : f32 to vector<1x512xf32>
    %34 = arith.mulf %32, %33 : vector<1x512xf32>
    %35 = vector.extract_strided_slice %2 {offsets = [2, 0], sizes = [1, 512], strides = [1, 1]} : vector<3x512xi32> to vector<1x512xi32>
    %c83492791_i32 = arith.constant 83492791 : i32
    %36 = vector.broadcast %c83492791_i32 : i32 to vector<1x512xi32>
    %37 = arith.muli %35, %36 : vector<1x512xi32>
    %c83492791_i32_3 = arith.constant 83492791 : i32
    %38 = vector.broadcast %c83492791_i32_3 : i32 to vector<1x512xi32>
    %39 = arith.addi %37, %38 : vector<1x512xi32>
    %40 = arith.xori %13, %25 : vector<1x512xi32>
    %c63_i32 = arith.constant 63 : i32
    %41 = vector.broadcast %c63_i32 : i32 to vector<1x512xi32>
    %42 = arith.andi %40, %41 : vector<1x512xi32>
    %43 = arith.mulf %9, %19 : vector<1x512xf32>
    %44 = arith.xori %42, %37 : vector<1x512xi32>
    %c63_i32_4 = arith.constant 63 : i32
    %45 = vector.broadcast %c63_i32_4 : i32 to vector<1x512xi32>
    %46 = arith.andi %44, %45 : vector<1x512xi32>
    %47 = arith.mulf %43, %31 : vector<1x512xf32>
    %48 = arith.xori %13, %25 : vector<1x512xi32>
    %c63_i32_5 = arith.constant 63 : i32
    %49 = vector.broadcast %c63_i32_5 : i32 to vector<1x512xi32>
    %50 = arith.andi %48, %49 : vector<1x512xi32>
    %51 = arith.mulf %9, %19 : vector<1x512xf32>
    %52 = arith.xori %50, %39 : vector<1x512xi32>
    %c63_i32_6 = arith.constant 63 : i32
    %53 = vector.broadcast %c63_i32_6 : i32 to vector<1x512xi32>
    %54 = arith.andi %52, %53 : vector<1x512xi32>
    %55 = arith.mulf %51, %34 : vector<1x512xf32>
    %56 = arith.xori %13, %27 : vector<1x512xi32>
    %c63_i32_7 = arith.constant 63 : i32
    %57 = vector.broadcast %c63_i32_7 : i32 to vector<1x512xi32>
    %58 = arith.andi %56, %57 : vector<1x512xi32>
    %59 = arith.mulf %9, %22 : vector<1x512xf32>
    %60 = arith.xori %58, %37 : vector<1x512xi32>
    %c63_i32_8 = arith.constant 63 : i32
    %61 = vector.broadcast %c63_i32_8 : i32 to vector<1x512xi32>
    %62 = arith.andi %60, %61 : vector<1x512xi32>
    %63 = arith.mulf %59, %31 : vector<1x512xf32>
    %64 = arith.xori %13, %27 : vector<1x512xi32>
    %c63_i32_9 = arith.constant 63 : i32
    %65 = vector.broadcast %c63_i32_9 : i32 to vector<1x512xi32>
    %66 = arith.andi %64, %65 : vector<1x512xi32>
    %67 = arith.mulf %9, %22 : vector<1x512xf32>
    %68 = arith.xori %66, %39 : vector<1x512xi32>
    %c63_i32_10 = arith.constant 63 : i32
    %69 = vector.broadcast %c63_i32_10 : i32 to vector<1x512xi32>
    %70 = arith.andi %68, %69 : vector<1x512xi32>
    %71 = arith.mulf %67, %34 : vector<1x512xf32>
    %72 = arith.xori %15, %25 : vector<1x512xi32>
    %c63_i32_11 = arith.constant 63 : i32
    %73 = vector.broadcast %c63_i32_11 : i32 to vector<1x512xi32>
    %74 = arith.andi %72, %73 : vector<1x512xi32>
    %75 = arith.mulf %12, %19 : vector<1x512xf32>
    %76 = arith.xori %74, %37 : vector<1x512xi32>
    %c63_i32_12 = arith.constant 63 : i32
    %77 = vector.broadcast %c63_i32_12 : i32 to vector<1x512xi32>
    %78 = arith.andi %76, %77 : vector<1x512xi32>
    %79 = arith.mulf %75, %31 : vector<1x512xf32>
    %80 = arith.xori %15, %25 : vector<1x512xi32>
    %c63_i32_13 = arith.constant 63 : i32
    %81 = vector.broadcast %c63_i32_13 : i32 to vector<1x512xi32>
    %82 = arith.andi %80, %81 : vector<1x512xi32>
    %83 = arith.mulf %12, %19 : vector<1x512xf32>
    %84 = arith.xori %82, %39 : vector<1x512xi32>
    %c63_i32_14 = arith.constant 63 : i32
    %85 = vector.broadcast %c63_i32_14 : i32 to vector<1x512xi32>
    %86 = arith.andi %84, %85 : vector<1x512xi32>
    %87 = arith.mulf %83, %34 : vector<1x512xf32>
    %88 = arith.xori %15, %27 : vector<1x512xi32>
    %c63_i32_15 = arith.constant 63 : i32
    %89 = vector.broadcast %c63_i32_15 : i32 to vector<1x512xi32>
    %90 = arith.andi %88, %89 : vector<1x512xi32>
    %91 = arith.mulf %12, %22 : vector<1x512xf32>
    %92 = arith.xori %90, %37 : vector<1x512xi32>
    %c63_i32_16 = arith.constant 63 : i32
    %93 = vector.broadcast %c63_i32_16 : i32 to vector<1x512xi32>
    %94 = arith.andi %92, %93 : vector<1x512xi32>
    %95 = arith.mulf %91, %31 : vector<1x512xf32>
    %96 = arith.xori %15, %27 : vector<1x512xi32>
    %c63_i32_17 = arith.constant 63 : i32
    %97 = vector.broadcast %c63_i32_17 : i32 to vector<1x512xi32>
    %98 = arith.andi %96, %97 : vector<1x512xi32>
    %99 = arith.mulf %12, %22 : vector<1x512xf32>
    %100 = arith.xori %98, %39 : vector<1x512xi32>
    %c63_i32_18 = arith.constant 63 : i32
    %101 = vector.broadcast %c63_i32_18 : i32 to vector<1x512xi32>
    %102 = arith.andi %100, %101 : vector<1x512xi32>
    %103 = arith.mulf %99, %34 : vector<1x512xf32>
    %104 = tpu.iota {dimensions = array<i32: 0>} : vector<16x512xi32>
    %105 = vector.broadcast %46 : vector<1x512xi32> to vector<16x512xi32>
    %106 = arith.cmpi eq, %104, %105 : vector<16x512xi32>
    %cst_19 = arith.constant 0.000000e+00 : f32
    %107 = vector.shape_cast %47 : vector<1x512xf32> to vector<1x512xf32>
    %108 = vector.broadcast %107 : vector<1x512xf32> to vector<16x512xf32>
    %109 = vector.broadcast %cst_19 : f32 to vector<16x512xf32>
    %110 = arith.select %106, %108, %109 : vector<16x512xi1>, vector<16x512xf32>
    %111 = vector.broadcast %54 : vector<1x512xi32> to vector<16x512xi32>
    %112 = arith.cmpi eq, %104, %111 : vector<16x512xi32>
    %113 = vector.broadcast %55 : vector<1x512xf32> to vector<16x512xf32>
    %114 = arith.addf %110, %113 : vector<16x512xf32>
    %115 = arith.select %112, %114, %110 : vector<16x512xi1>, vector<16x512xf32>
    %116 = vector.broadcast %62 : vector<1x512xi32> to vector<16x512xi32>
    %117 = arith.cmpi eq, %104, %116 : vector<16x512xi32>
    %118 = vector.broadcast %63 : vector<1x512xf32> to vector<16x512xf32>
    %119 = arith.addf %115, %118 : vector<16x512xf32>
    %120 = arith.select %117, %119, %115 : vector<16x512xi1>, vector<16x512xf32>
    %121 = vector.broadcast %70 : vector<1x512xi32> to vector<16x512xi32>
    %122 = arith.cmpi eq, %104, %121 : vector<16x512xi32>
    %123 = vector.broadcast %71 : vector<1x512xf32> to vector<16x512xf32>
    %124 = arith.addf %120, %123 : vector<16x512xf32>
    %125 = arith.select %122, %124, %120 : vector<16x512xi1>, vector<16x512xf32>
    %126 = vector.broadcast %78 : vector<1x512xi32> to vector<16x512xi32>
    %127 = arith.cmpi eq, %104, %126 : vector<16x512xi32>
    %128 = vector.broadcast %79 : vector<1x512xf32> to vector<16x512xf32>
    %129 = arith.addf %125, %128 : vector<16x512xf32>
    %130 = arith.select %127, %129, %125 : vector<16x512xi1>, vector<16x512xf32>
    %131 = vector.broadcast %86 : vector<1x512xi32> to vector<16x512xi32>
    %132 = arith.cmpi eq, %104, %131 : vector<16x512xi32>
    %133 = vector.broadcast %87 : vector<1x512xf32> to vector<16x512xf32>
    %134 = arith.addf %130, %133 : vector<16x512xf32>
    %135 = arith.select %132, %134, %130 : vector<16x512xi1>, vector<16x512xf32>
    %136 = vector.broadcast %94 : vector<1x512xi32> to vector<16x512xi32>
    %137 = arith.cmpi eq, %104, %136 : vector<16x512xi32>
    %138 = vector.broadcast %95 : vector<1x512xf32> to vector<16x512xf32>
    %139 = arith.addf %135, %138 : vector<16x512xf32>
    %140 = arith.select %137, %139, %135 : vector<16x512xi1>, vector<16x512xf32>
    %141 = vector.broadcast %102 : vector<1x512xi32> to vector<16x512xi32>
    %142 = arith.cmpi eq, %104, %141 : vector<16x512xi32>
    %143 = vector.broadcast %103 : vector<1x512xf32> to vector<16x512xf32>
    %144 = arith.addf %140, %143 : vector<16x512xf32>
    %145 = arith.select %142, %144, %140 : vector<16x512xi1>, vector<16x512xf32>
    %c0_20 = arith.constant 0 : index
    %c0_21 = arith.constant 0 : index
    %146 = vector.load %arg3[%c0_20, %c0_21] : memref<8x64xf32, #tpu.memory_space<vmem>>, vector<8x16xf32>
    %cst_22 = arith.constant dense<0.000000e+00> : vector<8x512xf32>
    %147 = tpu.matmul %146, %145, %cst_22 {dimension_numbers = #tpu.dot_dimension_numbers<[1], [0], [0], [1], [0, 0, 1, 1], [], []>} : vector<8x16xf32>, vector<16x512xf32>, vector<8x512xf32> -> vector<8x512xf32>
    %c16_i32 = arith.constant 16 : i32
    %148 = vector.broadcast %c16_i32 : i32 to vector<1x512xi32>
    %149 = arith.subi %46, %148 : vector<1x512xi32>
    %150 = vector.broadcast %149 : vector<1x512xi32> to vector<16x512xi32>
    %151 = arith.cmpi eq, %104, %150 : vector<16x512xi32>
    %cst_23 = arith.constant 0.000000e+00 : f32
    %152 = vector.shape_cast %47 : vector<1x512xf32> to vector<1x512xf32>
    %153 = vector.broadcast %152 : vector<1x512xf32> to vector<16x512xf32>
    %154 = vector.broadcast %cst_23 : f32 to vector<16x512xf32>
    %155 = arith.select %151, %153, %154 : vector<16x512xi1>, vector<16x512xf32>
    %c16_i32_24 = arith.constant 16 : i32
    %156 = vector.broadcast %c16_i32_24 : i32 to vector<1x512xi32>
    %157 = arith.subi %54, %156 : vector<1x512xi32>
    %158 = vector.broadcast %157 : vector<1x512xi32> to vector<16x512xi32>
    %159 = arith.cmpi eq, %104, %158 : vector<16x512xi32>
    %160 = vector.broadcast %55 : vector<1x512xf32> to vector<16x512xf32>
    %161 = arith.addf %155, %160 : vector<16x512xf32>
    %162 = arith.select %159, %161, %155 : vector<16x512xi1>, vector<16x512xf32>
    %c16_i32_25 = arith.constant 16 : i32
    %163 = vector.broadcast %c16_i32_25 : i32 to vector<1x512xi32>
    %164 = arith.subi %62, %163 : vector<1x512xi32>
    %165 = vector.broadcast %164 : vector<1x512xi32> to vector<16x512xi32>
    %166 = arith.cmpi eq, %104, %165 : vector<16x512xi32>
    %167 = vector.broadcast %63 : vector<1x512xf32> to vector<16x512xf32>
    %168 = arith.addf %162, %167 : vector<16x512xf32>
    %169 = arith.select %166, %168, %162 : vector<16x512xi1>, vector<16x512xf32>
    %c16_i32_26 = arith.constant 16 : i32
    %170 = vector.broadcast %c16_i32_26 : i32 to vector<1x512xi32>
    %171 = arith.subi %70, %170 : vector<1x512xi32>
    %172 = vector.broadcast %171 : vector<1x512xi32> to vector<16x512xi32>
    %173 = arith.cmpi eq, %104, %172 : vector<16x512xi32>
    %174 = vector.broadcast %71 : vector<1x512xf32> to vector<16x512xf32>
    %175 = arith.addf %169, %174 : vector<16x512xf32>
    %176 = arith.select %173, %175, %169 : vector<16x512xi1>, vector<16x512xf32>
    %c16_i32_27 = arith.constant 16 : i32
    %177 = vector.broadcast %c16_i32_27 : i32 to vector<1x512xi32>
    %178 = arith.subi %78, %177 : vector<1x512xi32>
    %179 = vector.broadcast %178 : vector<1x512xi32> to vector<16x512xi32>
    %180 = arith.cmpi eq, %104, %179 : vector<16x512xi32>
    %181 = vector.broadcast %79 : vector<1x512xf32> to vector<16x512xf32>
    %182 = arith.addf %176, %181 : vector<16x512xf32>
    %183 = arith.select %180, %182, %176 : vector<16x512xi1>, vector<16x512xf32>
    %c16_i32_28 = arith.constant 16 : i32
    %184 = vector.broadcast %c16_i32_28 : i32 to vector<1x512xi32>
    %185 = arith.subi %86, %184 : vector<1x512xi32>
    %186 = vector.broadcast %185 : vector<1x512xi32> to vector<16x512xi32>
    %187 = arith.cmpi eq, %104, %186 : vector<16x512xi32>
    %188 = vector.broadcast %87 : vector<1x512xf32> to vector<16x512xf32>
    %189 = arith.addf %183, %188 : vector<16x512xf32>
    %190 = arith.select %187, %189, %183 : vector<16x512xi1>, vector<16x512xf32>
    %c16_i32_29 = arith.constant 16 : i32
    %191 = vector.broadcast %c16_i32_29 : i32 to vector<1x512xi32>
    %192 = arith.subi %94, %191 : vector<1x512xi32>
    %193 = vector.broadcast %192 : vector<1x512xi32> to vector<16x512xi32>
    %194 = arith.cmpi eq, %104, %193 : vector<16x512xi32>
    %195 = vector.broadcast %95 : vector<1x512xf32> to vector<16x512xf32>
    %196 = arith.addf %190, %195 : vector<16x512xf32>
    %197 = arith.select %194, %196, %190 : vector<16x512xi1>, vector<16x512xf32>
    %c16_i32_30 = arith.constant 16 : i32
    %198 = vector.broadcast %c16_i32_30 : i32 to vector<1x512xi32>
    %199 = arith.subi %102, %198 : vector<1x512xi32>
    %200 = vector.broadcast %199 : vector<1x512xi32> to vector<16x512xi32>
    %201 = arith.cmpi eq, %104, %200 : vector<16x512xi32>
    %202 = vector.broadcast %103 : vector<1x512xf32> to vector<16x512xf32>
    %203 = arith.addf %197, %202 : vector<16x512xf32>
    %204 = arith.select %201, %203, %197 : vector<16x512xi1>, vector<16x512xf32>
    %c0_31 = arith.constant 0 : index
    %c16 = arith.constant 16 : index
    %205 = vector.load %arg3[%c0_31, %c16] : memref<8x64xf32, #tpu.memory_space<vmem>>, vector<8x16xf32>
    %cst_32 = arith.constant dense<0.000000e+00> : vector<8x512xf32>
    %206 = tpu.matmul %205, %204, %cst_32 {dimension_numbers = #tpu.dot_dimension_numbers<[1], [0], [0], [1], [0, 0, 1, 1], [], []>} : vector<8x16xf32>, vector<16x512xf32>, vector<8x512xf32> -> vector<8x512xf32>
    %207 = arith.addf %147, %206 : vector<8x512xf32>
    %c32_i32 = arith.constant 32 : i32
    %208 = vector.broadcast %c32_i32 : i32 to vector<1x512xi32>
    %209 = arith.subi %46, %208 : vector<1x512xi32>
    %210 = vector.broadcast %209 : vector<1x512xi32> to vector<16x512xi32>
    %211 = arith.cmpi eq, %104, %210 : vector<16x512xi32>
    %cst_33 = arith.constant 0.000000e+00 : f32
    %212 = vector.shape_cast %47 : vector<1x512xf32> to vector<1x512xf32>
    %213 = vector.broadcast %212 : vector<1x512xf32> to vector<16x512xf32>
    %214 = vector.broadcast %cst_33 : f32 to vector<16x512xf32>
    %215 = arith.select %211, %213, %214 : vector<16x512xi1>, vector<16x512xf32>
    %c32_i32_34 = arith.constant 32 : i32
    %216 = vector.broadcast %c32_i32_34 : i32 to vector<1x512xi32>
    %217 = arith.subi %54, %216 : vector<1x512xi32>
    %218 = vector.broadcast %217 : vector<1x512xi32> to vector<16x512xi32>
    %219 = arith.cmpi eq, %104, %218 : vector<16x512xi32>
    %220 = vector.broadcast %55 : vector<1x512xf32> to vector<16x512xf32>
    %221 = arith.addf %215, %220 : vector<16x512xf32>
    %222 = arith.select %219, %221, %215 : vector<16x512xi1>, vector<16x512xf32>
    %c32_i32_35 = arith.constant 32 : i32
    %223 = vector.broadcast %c32_i32_35 : i32 to vector<1x512xi32>
    %224 = arith.subi %62, %223 : vector<1x512xi32>
    %225 = vector.broadcast %224 : vector<1x512xi32> to vector<16x512xi32>
    %226 = arith.cmpi eq, %104, %225 : vector<16x512xi32>
    %227 = vector.broadcast %63 : vector<1x512xf32> to vector<16x512xf32>
    %228 = arith.addf %222, %227 : vector<16x512xf32>
    %229 = arith.select %226, %228, %222 : vector<16x512xi1>, vector<16x512xf32>
    %c32_i32_36 = arith.constant 32 : i32
    %230 = vector.broadcast %c32_i32_36 : i32 to vector<1x512xi32>
    %231 = arith.subi %70, %230 : vector<1x512xi32>
    %232 = vector.broadcast %231 : vector<1x512xi32> to vector<16x512xi32>
    %233 = arith.cmpi eq, %104, %232 : vector<16x512xi32>
    %234 = vector.broadcast %71 : vector<1x512xf32> to vector<16x512xf32>
    %235 = arith.addf %229, %234 : vector<16x512xf32>
    %236 = arith.select %233, %235, %229 : vector<16x512xi1>, vector<16x512xf32>
    %c32_i32_37 = arith.constant 32 : i32
    %237 = vector.broadcast %c32_i32_37 : i32 to vector<1x512xi32>
    %238 = arith.subi %78, %237 : vector<1x512xi32>
    %239 = vector.broadcast %238 : vector<1x512xi32> to vector<16x512xi32>
    %240 = arith.cmpi eq, %104, %239 : vector<16x512xi32>
    %241 = vector.broadcast %79 : vector<1x512xf32> to vector<16x512xf32>
    %242 = arith.addf %236, %241 : vector<16x512xf32>
    %243 = arith.select %240, %242, %236 : vector<16x512xi1>, vector<16x512xf32>
    %c32_i32_38 = arith.constant 32 : i32
    %244 = vector.broadcast %c32_i32_38 : i32 to vector<1x512xi32>
    %245 = arith.subi %86, %244 : vector<1x512xi32>
    %246 = vector.broadcast %245 : vector<1x512xi32> to vector<16x512xi32>
    %247 = arith.cmpi eq, %104, %246 : vector<16x512xi32>
    %248 = vector.broadcast %87 : vector<1x512xf32> to vector<16x512xf32>
    %249 = arith.addf %243, %248 : vector<16x512xf32>
    %250 = arith.select %247, %249, %243 : vector<16x512xi1>, vector<16x512xf32>
    %c32_i32_39 = arith.constant 32 : i32
    %251 = vector.broadcast %c32_i32_39 : i32 to vector<1x512xi32>
    %252 = arith.subi %94, %251 : vector<1x512xi32>
    %253 = vector.broadcast %252 : vector<1x512xi32> to vector<16x512xi32>
    %254 = arith.cmpi eq, %104, %253 : vector<16x512xi32>
    %255 = vector.broadcast %95 : vector<1x512xf32> to vector<16x512xf32>
    %256 = arith.addf %250, %255 : vector<16x512xf32>
    %257 = arith.select %254, %256, %250 : vector<16x512xi1>, vector<16x512xf32>
    %c32_i32_40 = arith.constant 32 : i32
    %258 = vector.broadcast %c32_i32_40 : i32 to vector<1x512xi32>
    %259 = arith.subi %102, %258 : vector<1x512xi32>
    %260 = vector.broadcast %259 : vector<1x512xi32> to vector<16x512xi32>
    %261 = arith.cmpi eq, %104, %260 : vector<16x512xi32>
    %262 = vector.broadcast %103 : vector<1x512xf32> to vector<16x512xf32>
    %263 = arith.addf %257, %262 : vector<16x512xf32>
    %264 = arith.select %261, %263, %257 : vector<16x512xi1>, vector<16x512xf32>
    %c0_41 = arith.constant 0 : index
    %c32 = arith.constant 32 : index
    %265 = vector.load %arg3[%c0_41, %c32] : memref<8x64xf32, #tpu.memory_space<vmem>>, vector<8x16xf32>
    %cst_42 = arith.constant dense<0.000000e+00> : vector<8x512xf32>
    %266 = tpu.matmul %265, %264, %cst_42 {dimension_numbers = #tpu.dot_dimension_numbers<[1], [0], [0], [1], [0, 0, 1, 1], [], []>} : vector<8x16xf32>, vector<16x512xf32>, vector<8x512xf32> -> vector<8x512xf32>
    %267 = arith.addf %207, %266 : vector<8x512xf32>
    %c48_i32 = arith.constant 48 : i32
    %268 = vector.broadcast %c48_i32 : i32 to vector<1x512xi32>
    %269 = arith.subi %46, %268 : vector<1x512xi32>
    %270 = vector.broadcast %269 : vector<1x512xi32> to vector<16x512xi32>
    %271 = arith.cmpi eq, %104, %270 : vector<16x512xi32>
    %cst_43 = arith.constant 0.000000e+00 : f32
    %272 = vector.shape_cast %47 : vector<1x512xf32> to vector<1x512xf32>
    %273 = vector.broadcast %272 : vector<1x512xf32> to vector<16x512xf32>
    %274 = vector.broadcast %cst_43 : f32 to vector<16x512xf32>
    %275 = arith.select %271, %273, %274 : vector<16x512xi1>, vector<16x512xf32>
    %c48_i32_44 = arith.constant 48 : i32
    %276 = vector.broadcast %c48_i32_44 : i32 to vector<1x512xi32>
    %277 = arith.subi %54, %276 : vector<1x512xi32>
    %278 = vector.broadcast %277 : vector<1x512xi32> to vector<16x512xi32>
    %279 = arith.cmpi eq, %104, %278 : vector<16x512xi32>
    %280 = vector.broadcast %55 : vector<1x512xf32> to vector<16x512xf32>
    %281 = arith.addf %275, %280 : vector<16x512xf32>
    %282 = arith.select %279, %281, %275 : vector<16x512xi1>, vector<16x512xf32>
    %c48_i32_45 = arith.constant 48 : i32
    %283 = vector.broadcast %c48_i32_45 : i32 to vector<1x512xi32>
    %284 = arith.subi %62, %283 : vector<1x512xi32>
    %285 = vector.broadcast %284 : vector<1x512xi32> to vector<16x512xi32>
    %286 = arith.cmpi eq, %104, %285 : vector<16x512xi32>
    %287 = vector.broadcast %63 : vector<1x512xf32> to vector<16x512xf32>
    %288 = arith.addf %282, %287 : vector<16x512xf32>
    %289 = arith.select %286, %288, %282 : vector<16x512xi1>, vector<16x512xf32>
    %c48_i32_46 = arith.constant 48 : i32
    %290 = vector.broadcast %c48_i32_46 : i32 to vector<1x512xi32>
    %291 = arith.subi %70, %290 : vector<1x512xi32>
    %292 = vector.broadcast %291 : vector<1x512xi32> to vector<16x512xi32>
    %293 = arith.cmpi eq, %104, %292 : vector<16x512xi32>
    %294 = vector.broadcast %71 : vector<1x512xf32> to vector<16x512xf32>
    %295 = arith.addf %289, %294 : vector<16x512xf32>
    %296 = arith.select %293, %295, %289 : vector<16x512xi1>, vector<16x512xf32>
    %c48_i32_47 = arith.constant 48 : i32
    %297 = vector.broadcast %c48_i32_47 : i32 to vector<1x512xi32>
    %298 = arith.subi %78, %297 : vector<1x512xi32>
    %299 = vector.broadcast %298 : vector<1x512xi32> to vector<16x512xi32>
    %300 = arith.cmpi eq, %104, %299 : vector<16x512xi32>
    %301 = vector.broadcast %79 : vector<1x512xf32> to vector<16x512xf32>
    %302 = arith.addf %296, %301 : vector<16x512xf32>
    %303 = arith.select %300, %302, %296 : vector<16x512xi1>, vector<16x512xf32>
    %c48_i32_48 = arith.constant 48 : i32
    %304 = vector.broadcast %c48_i32_48 : i32 to vector<1x512xi32>
    %305 = arith.subi %86, %304 : vector<1x512xi32>
    %306 = vector.broadcast %305 : vector<1x512xi32> to vector<16x512xi32>
    %307 = arith.cmpi eq, %104, %306 : vector<16x512xi32>
    %308 = vector.broadcast %87 : vector<1x512xf32> to vector<16x512xf32>
    %309 = arith.addf %303, %308 : vector<16x512xf32>
    %310 = arith.select %307, %309, %303 : vector<16x512xi1>, vector<16x512xf32>
    %c48_i32_49 = arith.constant 48 : i32
    %311 = vector.broadcast %c48_i32_49 : i32 to vector<1x512xi32>
    %312 = arith.subi %94, %311 : vector<1x512xi32>
    %313 = vector.broadcast %312 : vector<1x512xi32> to vector<16x512xi32>
    %314 = arith.cmpi eq, %104, %313 : vector<16x512xi32>
    %315 = vector.broadcast %95 : vector<1x512xf32> to vector<16x512xf32>
    %316 = arith.addf %310, %315 : vector<16x512xf32>
    %317 = arith.select %314, %316, %310 : vector<16x512xi1>, vector<16x512xf32>
    %c48_i32_50 = arith.constant 48 : i32
    %318 = vector.broadcast %c48_i32_50 : i32 to vector<1x512xi32>
    %319 = arith.subi %102, %318 : vector<1x512xi32>
    %320 = vector.broadcast %319 : vector<1x512xi32> to vector<16x512xi32>
    %321 = arith.cmpi eq, %104, %320 : vector<16x512xi32>
    %322 = vector.broadcast %103 : vector<1x512xf32> to vector<16x512xf32>
    %323 = arith.addf %317, %322 : vector<16x512xf32>
    %324 = arith.select %321, %323, %317 : vector<16x512xi1>, vector<16x512xf32>
    %c0_51 = arith.constant 0 : index
    %c48 = arith.constant 48 : index
    %325 = vector.load %arg3[%c0_51, %c48] : memref<8x64xf32, #tpu.memory_space<vmem>>, vector<8x16xf32>
    %cst_52 = arith.constant dense<0.000000e+00> : vector<8x512xf32>
    %326 = tpu.matmul %325, %324, %cst_52 {dimension_numbers = #tpu.dot_dimension_numbers<[1], [0], [0], [1], [0, 0, 1, 1], [], []>} : vector<8x16xf32>, vector<16x512xf32>, vector<8x512xf32> -> vector<8x512xf32>
    %327 = arith.addf %267, %326 : vector<8x512xf32>
    %c0_53 = arith.constant 0 : index
    %c0_54 = arith.constant 0 : index
    %328 = vector.load %arg4[%c0_53, %c0_54] : memref<8x512xf32, #tpu.memory_space<vmem>>, vector<8x512xf32>
    tpu.vector_store %arg4[%c0_53, %c0_54], %327 {strides = array<i32>} : memref<8x512xf32, #tpu.memory_space<vmem>>, vector<8x512xf32>,
    return
  }
  func.func @transform_0(%arg0: i32) -> i32 {
    %c0_i32 = arith.constant 0 : i32
    %c0_i32_0 = arith.constant 0 : i32
    return %c0_i32 : i32
  }
  func.func @transform_1(%arg0: i32) -> (i32, i32) {
    %c0_i32 = arith.constant 0 : i32
    %c0_i32_0 = arith.constant 0 : i32
    return %c0_i32, %arg0 : i32, i32
  }
  func.func @transform_2(%arg0: i32) -> (i32, i32) {
    %c0_i32 = arith.constant 0 : i32
    %c0_i32_0 = arith.constant 0 : i32
    %c0_i32_1 = arith.constant 0 : i32
    return %c0_i32, %c0_i32_0 : i32, i32
  }
  func.func @transform_3(%arg0: i32) -> (i32, i32) {
    %c0_i32 = arith.constant 0 : i32
    %c0_i32_0 = arith.constant 0 : i32
    return %c0_i32, %arg0 : i32, i32
  }
}

</mosaic_0001>

<bundles_post_ra>
// kernel: tpu_custom_call.1
= control target key start
LH: loop header
LB: loop body
LE: loop exit
PB: predicated region body
PF: predicated region fallthrough
CT: control target
= control target key end

     0   :  { %8 = vsyncpa [#allocation5], 0  ;;  %s5434_s0 = inlined_call_operand.hbm [shape: f32[3], index: 0, kind: input, shape index: {}]   ;;  %s5435_s1 = inlined_call_operand.hbm [shape: f32[3,1024], index: 1, kind: input, shape index: {}]   ;;  %s5436_s2 = inlined_call_operand.hbm [shape: f32[8,64], index: 2, kind: input, shape index: {}]   ;;  %s5437_s3 = inlined_call_operand.hbm [shape: f32[8,1024], index: 3, kind: output, shape index: {}]  }
   0x1   :  { %9 = vsyncpa [#allocation3], 0 }
   0x2   :  { %11 = vsyncpa [#allocation3 + $0x1], 0 }
   0x3   :  { %12 = vsyncpa [#allocation8], 0 }
   0x4   :  { %13 = vsyncpa [#allocation4], 0 }
   0x5   :  { %15 = vsyncpa [#allocation4 + $0x1], 0  ;;  %s3564_s12 = smov 0   ;;  %s3566_s13 = smov 0  }
   0x6   :  { %s3568_s14 = smov 0   ;;  %s3570_s15 = smov 0  }
   0x7 LB: > { %s3585_s16 = sadd.s32 4294967295, %s3534_s15   ;;  %s3191_s17 = sadd.s32 4294967294, %s3534_s15   ;;  %s3534_s15 = sphi %s3570_s15, %s5636_s15   ;;  %s3530_s14 = sphi %s3568_s14, %s5635_s14   ;;  %s3526_s13 = sphi %s3566_s13, %s5634_s13   ;;  %s3522_s12 = sphi %s3564_s12, %s5633_s12  }
   0x8   : > { %p62_p0 = scmp.ne.s32.totalorder %s3526_s13, %s3522_s12  ;;  %p5438_p1 = scmp.eq.s32.totalorder %s3585_s16, 0 }
   0x9   : > { %p113_p3 = scmp.eq.s32.totalorder %s3191_s17, 1  ;;  %p3192_p5 = scmp.ge.s32.totalorder %s3534_s15, 1 }
   0xa   : > { %p3594_p4 = por %p5438_p1, %p62_p0  ;;  %p120_p7 = scmp.lt.s32.totalorder %s3534_s15, 3 }
   0xb   : > { %p3599_p6 = por %p113_p3, %p62_p0  ;;  %s3536_s21 = smov [#allocation7]  }
   0xc   : > { %s5528_s18 = scalar_select %p3594_p4, 1, 0 }
   0xd   : > { %s5529_s19 = scalar_select %p3599_p6, 1, 0 }
   0xe   : > { %p3604_p8 = pnand %p3192_p5, %p120_p7  ;;  %s142_s22 = sshll.u32 %s3536_s21, 4  ;;  %s3611_s22 = int_to_ptr.vmem [resolvable:$true] %s142_s22 }
   0xf   : > { %s3620_s24 = sadd.s32 1, %s3534_s15   ;;  %s49_s26 = sadd.s32 1, %s3530_s14 }
  0x10   : > { %p3329_p10 = pneg %p3604_p8  ;;  %s46_s25 = ssub.s32 %s3534_s15, %s3620_s24 }
  0x11   : > { %p3625_p12 = scmp.eq.s32.totalorder %s46_s25, 0  ;;  %s3389_s30 = scalar_lea.hbm %s5434_s0, 16 }
  0x12   : > { %p3615_p11 = pnand %p3329_p10, %p5438_p1  ;;  %p3390_p13 = scmp.ne.s32.totalorder %s5434_s0, %s3389_s30 }
  0x13   : > { %p3396_p7 = scmp.lt.u32.totalorder %s3389_s30, %s5434_s0 }
  0x14   : > { %p3391_p0 = pneg %p3615_p11 }
  0x16   : > { %p3392_p3 = pnand %p3391_p0, %p3390_p13 }
  0x18   : > { %p3393_p5 = pneg %p3392_p3 }
  0x1a   : > { %p3398_p10 = pnand %p3396_p7, %p3393_p5 }
  0x1c   : > { %3401 = shalt.err (!%p3398_p10)
}
  0x1d   : > { %s3537_s8 = smov [#allocation2]   ;;  %s3402_s21 = scalar_lea.hbm %s5436_s2, 128 }
  0x1e   : > { %3332 = dma.hbm_to_smem (!%p3615_p11), %s5434_s0, 16, %s3537_s8, [#allocation5]  }
  0x1f   : > { %p3403_p13 = scmp.ne.s32.totalorder %s5436_s2, %s3402_s21  ;;  %p3409_p7 = scmp.lt.u32.totalorder %s3402_s21, %s5436_s2 }
  0x21   : > { %p3405_p3 = pnand %p3403_p13, %p3391_p0 }
  0x23   : > { %p3406_p5 = pneg %p3405_p3 }
  0x25   : > { %p3411_p10 = pnand %p3409_p7, %p3406_p5 }
  0x27   : > { %3414 = shalt.err (!%p3411_p10)
}
  0x28   : > { %s3415_s4 = scalar_lea.vmem %s3611_s22, 128  ;;  %p3423_p6 = scmp.lt.s32.totalorder %s3611_s22, %s3611_s22 }
  0x29   : > { %p3416_p9 = scmp.ne.s32.totalorder %s3611_s22, %s3415_s4  ;;  %p3424_p13 = scmp.lt.s32.totalorder %s3415_s4, %s3415_s4 }
  0x2b   : > { %p3418_p1 = pnand %p3416_p9, %p3391_p0  ;;  %p3425_p3 = por %p3424_p13, %p3423_p6 }
  0x2d   : > { %p3419_p2 = pneg %p3418_p1 }
  0x2f   : > { %p3426_p4 = pnand %p3425_p3, %p3419_p2 }
  0x31   : > { %3429 = shalt.err (!%p3426_p4)
}
  0x32   : > { %3335 = dma.hbm_to_vmem [thread:$0]  (!%p3615_p11), %s5436_s2, 128, %s3611_s22, [#allocation8]  }
  0x33   : > { %s3678_s7 = scalar_select %p3625_p12, %s3530_s14, %s49_s26  }
  0x34   : > { %p56_p1 = scmp.ne.s32.totalorder %s3530_s14, %s3526_s13  ;;  %p57_p2 = scmp.eq.s32.totalorder %s3534_s15, 0 }
  0x35   : > { %p3346_p4 = scmp.lt.s32.totalorder %s3534_s15, 2  ;;  %s153_s23 = sand.u32 1, %s3530_s14  }
  0x36   : > { %p58_p6 = por %p57_p2, %p56_p1  ;;  %p5533_p9 = scmp.eq.s32.totalorder %s3585_s16, 1 }
  0x37   : > { %s3196_s9 = sshll.u32 %s153_s23, 4  ;;  %s3267_s10 = sshll.u32 %s3534_s15, 8 }
  0x38   : > { %p3687_p0 = por %p5533_p9, %p56_p1  ;;  %s3695_s22 = scalar_lea.hbm %s5435_s1, %s3267_s10 }
  0x39   : > { %s157_s26 = scalar_lea.vmem [#allocation6], %s3196_s9  ;;  %p3699_p11 = pnand %p3346_p4, %p58_p6 }
  0x3a   : > { %s5534_s8 = scalar_select %p3687_p0, 1, 0 }
  0x3b   : > { %s165_s27 = sshll.u32 %s157_s26, 4  ;;  %s154_s25 = scalar_lea.sflag [#allocation3], %s153_s23  ;;  %s3697_s27 = int_to_ptr.vmem [resolvable:$true] %s165_s27 }
  0x3c   : > { %s3430_s28 = scalar_lea.hbm %s3695_s22, 256  ;;  %p3432_p5 = pneg %p3699_p11 }
  0x3d   : > { %p3431_p12 = scmp.ne.s32.totalorder %s3695_s22, %s3430_s28  ;;  %s3435_s4 = scalar_lea.hbm %s5435_s1, 512 }
  0x3e   : > { %p3436_p13 = scmp.lt.u32.totalorder %s3695_s22, %s5435_s1  ;;  %p3437_p3 = scmp.lt.u32.totalorder %s3435_s4, %s3430_s28 }
  0x3f   : > { %p3433_p7 = pnand %p3432_p5, %p3431_p12  ;;  %p3439_p2 = scmp.lt.u32.totalorder %s3430_s28, %s3695_s22 }
  0x40   : > { %p3438_p1 = por %p3437_p3, %p3436_p13 }
  0x41   : > { %p3434_p10 = pneg %p3433_p7 }
  0x42   : > { %p3440_p4 = por %p3439_p2, %p3438_p1 }
  0x44   : > { %p3441_p6 = pnand %p3440_p4, %p3434_p10 }
  0x46   : > { %3444 = shalt.err (!%p3441_p6)
}
  0x47   : > { %s3445_s23 = scalar_lea.vmem %s3697_s27, 256  ;;  %s3538_s9 = smov [#allocation6]  }
  0x48   : > { %p3446_p9 = scmp.ne.s32.totalorder %s3697_s27, %s3445_s23  ;;  %s3450_s10 = sshll.u32 %s3538_s9, 4  ;;  %s3451_s10 = int_to_ptr.vmem [resolvable:$false] %s3450_s10 }
  0x49   : > { %s3452_s11 = scalar_lea.vmem %s3451_s10, 512  ;;  %p3453_p0 = scmp.lt.s32.totalorder %s3697_s27, %s3451_s10 }
  0x4a   : > { %p3448_p12 = pnand %p3446_p9, %p3432_p5  ;;  %p3454_p13 = scmp.lt.s32.totalorder %s3452_s11, %s3445_s23 }
  0x4c   : > { %p3449_p7 = pneg %p3448_p12  ;;  %p3455_p3 = por %p3454_p13, %p3453_p0 }
  0x4e   : > { %p3456_p1 = pnand %p3455_p3, %p3449_p7 }
  0x50   : > { %3459 = shalt.err (!%p3456_p1)
}
  0x51   : > { %3339 = dma.hbm_to_vmem [thread:$0]  (!%p3699_p11), %s3695_s22, 256, %s3697_s27, %s154_s25  }
  0x52   : > { %174 = sbr.rel (%p3604_p8) target bundleno = 661 (0x295), region = 32 }
  0x59   : > { %p5536_p5 = scmp.eq.s32.totalorder %s3585_s16, 0 }
  0x5b   : > { %3505 = dma.done.wait (%p5536_p5), [#allocation5], 16   ;;  %p5537_p10 = pmov %p5536_p5 }
  0x5c   : > { %s3735_s17 = sand.u32 1, %s3526_s13   ;;  %p5538_p0 = scmp.ne.s32.totalorder %s5528_s18, 0 }
  0x5d   : > { %3507 = vsyncadd (%p5537_p10), [#allocation5], 4294967280  ;;  %s3201_s26 = sshll.u32 %s3735_s17, 4  ;;  %s181_s21 = scalar_lea.sflag [#allocation3], %s3735_s17 }
  0x5e   : > { %s184_s28 = scalar_lea.vmem [#allocation6], %s3201_s26 }
  0x5f   : > { %3509 = dma.done.wait (%p5538_p0), %s181_s21, 256  }
  0x60   : > { %3511 = vsyncadd (%p5538_p0), %s181_s21, 4294967040  ;;  %p5539_p8 = pmov %p5536_p5 }
  0x61   : > { %p5540_p11 = pmov %p5536_p5 }
  0x62   : > { %3513 = dma.done.wait (%p5539_p8), [#allocation8], 128  }
  0x63   : > { %3515 = vsyncadd (%p5540_p11), [#allocation8], 4294967168 }
  0x64   : > { %193 = sfence }
  0x65   : > { %v1119_v0 = vld [vmem:[#allocation7] sm:$0xff]  ;;  %s3539_s20 = smov 112   ;;  %s224_s22 = sld [smem:[#allocation2]]  ;;  %v372_v3 = vlaneseq  ;;  %v215_v6 = vld [vmem:[%s184_s28 + $0x8] sm:$0x77]  ;;  %v5441_v11 = vmov 0.0  }
  0x66   : > { %v214_v1 = vld [vmem:[%s184_s28] sm:$0x77]  ;;  %1577 = vrot.lane.b32.xlu0 %v1119_v0, %s3539_s20  ;;  %s3540_s27 = smov 80   ;;  %s3204_s25 = sld [smem:[#allocation2 + $0x1]]  ;;  %v217_v10 = vfloor.f32 %v215_v6  ;;  %1646 = vmatprep.mubr.f32.mxu0 %v5441_v11 }
  0x67   : > { %v216_v2 = vfloor.f32 %v214_v1  ;;  %2930 = vrot.lane.b32.xlu1 %v1119_v0, %s3540_s27  ;;  %s3205_s29 = sld [smem:[#allocation2 + $0x2]]  ;;  %s3541_s18 = smov 96   ;;  %v3747_v9 = vshrl.u32 %v372_v3, 7  ;;  %1717 = vmatprep.mubr.f32.mxu1 %v5441_v11 }
  0x68   : > { %v3315_v50 = vtrunc.f32 %v217_v10  ;;  %v3778_v62 = vsub.f32 %v215_v6, %v217_v10  ;;  %s3203_s30 = sshll.u32 %s3735_s17, 5  ;;  %s3268_s5 = sshll.u32 %s3585_s16, 9 }
  0x69   : > { %v3313_v4 = vtrunc.f32 %v216_v2  ;;  %v220_v5 = vsub.f32 %v214_v1, %v216_v2  ;;  %v3764_v49 = vadd.s32 8, %v3747_v9  ;;  %v3767_v54 = vsub.s32 4, %v3747_v9  ;;  %s211_s4 = scalar_lea.vmem [#allocation9], %s3203_s30  ;;  %s5390_s10 = scalar_lea.hbm %s5437_s3, %s3268_s5 }
  0x6a   : > { %2324 = vrot.lane.b32.xlu0 %v1119_v0, %s3541_s18  ;;  %v3776_v61 = vsub.s32 0, %v3747_v9  ;;  %v3782_v2 = vcvt.f32.s32 %v3315_v50  ;;  %s3099_s6 = sshll.u32 %s211_s4, 4  ;;  %s3085_s11 = scalar_lea.sflag [#allocation4], %s3735_s17  ;;  %s5392_s6 = int_to_ptr.vmem [resolvable:$true] %s3099_s6 }
  0x6b   : > { %v3314_v7 = vcvt.f32.s32 %v3313_v4  ;;  %v222_v8 = vsub.f32 1.0, %v220_v5  ;;  %v3751_v12 = vstv %s224_s22  ;;  %s3460_s26 = scalar_lea.vmem %s5392_s6, 512  ;;  %p5630_p4 = scmp.ne.s32.totalorder %s5534_s8, 0 }
  0x6c   : > { %v226_v16 = vmul.f32 %v3751_v12, %v220_v5  ;;  %v3755_v18 = vstv %s3204_s25  ;;  %p3461_p2 = scmp.ne.s32.totalorder %s5392_s6, %s3460_s26  ;;  %s3543_s16 = smov [#allocation9]  }
  0x6d   : > { %v230_v13 = vadd.s32 1, %v3314_v7  ;;  %v238_v14 = vmul.u32 19349663, %v3314_v7  ;;  %v248_v15 = vmul.u32 83492791, %v3314_v7  ;;  %v228_v17 = vmul.f32 %v3751_v12, %v222_v8  ;;  %s3464_s21 = sshll.u32 %s3543_s16, 4  ;;  %s3465_s21 = int_to_ptr.vmem [resolvable:$false] %s3464_s21 }
  0x6e   : > { %v3757_v19 = vstv %s3205_s29  ;;  %v234_v20 = vmul.f32 %v3755_v18, %v220_v5  ;;  %v236_v21 = vmul.f32 %v3755_v18, %v222_v8  ;;  %p3462_p6 = pnand %p3461_p2, %p5630_p4  ;;  %s3466_s28 = scalar_lea.vmem %s3465_s21, 1024 }
  0x6f   : > { %v240_v22 = vadd.s32 19349663, %v238_v14  ;;  %v244_v23 = vmul.f32 %v3757_v19, %v220_v5  ;;  %v246_v24 = vmul.f32 %v3757_v19, %v222_v8  ;;  %v250_v25 = vadd.s32 83492791, %v248_v15  ;;  %p3467_p12 = scmp.lt.s32.totalorder %s5392_s6, %s3465_s21  ;;  %p3468_p7 = scmp.lt.s32.totalorder %s3466_s28, %s3460_s26 }
  0x70   : > { %v252_v26 = vrot.slane %v238_v14, 5  ;;  %v270_v27 = vrot.slane %v248_v15, 6  ;;  %v262_v28 = vrot.slane %v234_v20, 5  ;;  %v316_v31 = vrot.slane %v236_v21, 5  ;;  %p3463_p9 = pneg %p3462_p6 }
  0x71   : > { %v280_v29 = vrot.slane %v244_v23, 6  ;;  %v306_v30 = vrot.slane %v240_v22, 5  ;;  %v288_v34 = vrot.slane %v250_v25, 6  ;;  %v298_v35 = vrot.slane %v246_v24, 6  ;;  %p3469_p13 = por %p3468_p7, %p3467_p12 }
  0x72   : > { %v253_v32 = vrot.slane %v252_v26, 4  ;;  %v271_v33 = vrot.slane %v270_v27, 4  ;;  %v263_v36 = vrot.slane %v262_v28, 4  ;;  %v317_v39 = vrot.slane %v316_v31, 4 }
  0x73   : > { %v281_v37 = vrot.slane %v280_v29, 4  ;;  %v307_v38 = vrot.slane %v306_v30, 4  ;;  %v289_v41 = vrot.slane %v288_v34, 4  ;;  %v299_v42 = vrot.slane %v298_v35, 4  ;;  %p3470_p3 = pnand %p3469_p13, %p3463_p9 }
  0x74   : > { %v256_v40 = vxor.u32 %v3314_v7, %v253_v32  ;;  %v336_v43 = vxor.u32 %v253_v32, %v230_v13  ;;  %v268_v44 = vmul.f32 %v263_v36, %v226_v16  ;;  %v322_v46 = vmul.f32 %v317_v39, %v226_v16 }
  0x75   : > { %v310_v45 = vxor.u32 %v3314_v7, %v307_v38  ;;  %v340_v52 = vmul.f32 %v263_v36, %v228_v17  ;;  %v354_v53 = vxor.u32 %v307_v38, %v230_v13  ;;  %v358_v7 = vmul.f32 %v317_v39, %v228_v17 }
  0x76   : > { %v258_v47 = vand.u32 63, %v256_v40  ;;  %v338_v48 = vand.u32 63, %v336_v43  ;;  %v3769_v56 = vmul.f32 %v281_v37, %v268_v44  ;;  %v3771_v58 = vmul.f32 %v299_v42, %v268_v44 }
  0x77   : > { %v312_v51 = vand.u32 63, %v310_v45  ;;  %v3773_v60 = vmul.f32 %v322_v46, %v281_v37  ;;  %v3780_v0 = vmul.f32 %v322_v46, %v299_v42  ;;  %v3784_v3 = vmul.f32 %v340_v52, %v281_v37 }
  0x78   : > { %v274_v55 = vxor.u32 %v271_v33, %v258_v47  ;;  %v292_v57 = vxor.u32 %v289_v41, %v258_v47  ;;  %v342_v1 = vxor.u32 %v338_v48, %v271_v33  ;;  %v348_v4 = vxor.u32 %v338_v48, %v289_v41 }
  0x79   : > { %v324_v59 = vxor.u32 %v312_v51, %v271_v33  ;;  %v330_v63 = vxor.u32 %v312_v51, %v289_v41  ;;  %v356_v5 = vand.u32 63, %v354_v53  ;;  %v424_v14 = vrot.slane %v3769_v56, %v3767_v54 }
  0x7a   : > { %v3786_v8 = vand.u32 63, %v274_v55  ;;  %v3788_v13 = vand.u32 63, %v292_v57  ;;  %v510_v6 = vrot.slane %v3771_v58, %v3767_v54  ;;  %v604_v20 = vrot.slane %v3773_v60, %v3767_v54 }
  0x7b   : > { %v3794_v10 = vand.u32 63, %v324_v59  ;;  %v360_v15 = vxor.u32 %v356_v5, %v271_v33  ;;  %v366_v16 = vxor.u32 %v356_v5, %v289_v41  ;;  %v3798_v21 = vand.u32 63, %v330_v63 }
  0x7c   : > { %5541 = vst [vmem:[#allocation14_spill] sm:$0xff] %v3786_v8  ;;  %v3800_v17 = vand.u32 63, %v342_v1  ;;  %v3802_v22 = vmul.f32 %v340_v52, %v299_v42  ;;  %v698_v23 = vrot.slane %v3780_v0, %v3767_v54  ;;  %v3806_v24 = vand.u32 63, %v348_v4 }
  0x7d   : > { %v3808_v25 = vmul.f32 %v358_v7, %v281_v37  ;;  %v3810_v26 = vmul.f32 %v358_v7, %v299_v42  ;;  %v3813_v27 = vrot.slane %v424_v14, %v3776_v61  ;;  %v3815_v28 = vand.u32 63, %v360_v15 }
  0x7e   : > { %5542 = vst [vmem:[#allocation15_spill] sm:$0xff] %v3800_v17  ;;  %5543 = vst [vmem:[#allocation16_spill] sm:$0xff] %v3806_v24  ;;  %v3817_v29 = vand.u32 63, %v366_v16  ;;  %v3820_v30 = vrot.slane %v510_v6, %v3776_v61  ;;  %v792_v31 = vrot.slane %v3784_v3, %v3767_v54  ;;  %v3825_v32 = vrot.slane %v604_v20, %v3776_v61 }
  0x7f   : > { %5544 = vst [vmem:[#allocation17_spill] sm:$0xff] %v3813_v27  ;;  %5545 = vst [vmem:[#allocation18_spill] sm:$0xff] %v3815_v28  ;;  %v3828_v33 = vadd.s32 4294967280, %v3786_v8  ;;  %v3831_v34 = vadd.s32 4294967280, %v3788_v13  ;;  %v3834_v35 = vadd.s32 4294967280, %v3794_v10  ;;  %v3837_v36 = vrot.slane %v698_v23, %v3776_v61 }
  0x80   : > { %5546 = vst [vmem:[#allocation19_spill] sm:$0xff] %v3817_v29  ;;  %5547 = vst [vmem:[#allocation20_spill] sm:$0xff] %v3820_v30  ;;  %v886_v37 = vrot.slane %v3802_v22, %v3767_v54  ;;  %v3842_v38 = vadd.s32 4294967280, %v3798_v21  ;;  %v3845_v39 = vadd.s32 4294967280, %v3800_v17  ;;  %v3854_v43 = vadd.s32 4294967280, %v3806_v24 }
  0x81   : > { %5548 = vst [vmem:[#allocation21_spill] sm:$0xff] %v3825_v32  ;;  %5549 = vst [vmem:[#allocation22_spill] sm:$0xff] %v3837_v36  ;;  %v1129_v40 = vrot.slane %v3828_v33, %v3767_v54  ;;  %v1179_v41 = vrot.slane %v3831_v34, %v3767_v54  ;;  %v1237_v42 = vrot.slane %v3834_v35, %v3767_v54  ;;  %v3864_v47 = vadd.s32 4294967280, %v3815_v28 }
  0x82   : > { %v3857_v44 = vrot.slane %v792_v31, %v3776_v61  ;;  %v980_v45 = vrot.slane %v3808_v25, %v3767_v54  ;;  %v1295_v46 = vrot.slane %v3842_v38, %v3767_v54  ;;  %v1353_v51 = vrot.slane %v3845_v39, %v3767_v54 }
  0x83   : > { %v1145_v48 = vrot.slane %v1129_v40, %v3776_v61  ;;  %v1195_v50 = vrot.slane %v1179_v41, %v3776_v61  ;;  %v3871_v52 = vadd.s32 4294967280, %v3817_v29  ;;  %v3874_v53 = vrot.slane %v886_v37, %v3776_v61 }
  0x84   : > { %5550 = vst [vmem:[#allocation23_spill] sm:$0xff] %v3857_v44  ;;  %v1074_v55 = vrot.slane %v3810_v26, %v3767_v54  ;;  %v1253_v57 = vrot.slane %v1237_v42, %v3776_v61  ;;  %v1411_v59 = vrot.slane %v3854_v43, %v3767_v54  ;;  %v1311_v63 = vrot.slane %v1295_v46, %v3776_v61 }
  0x85   : > { %5551 = vst [vmem:[#allocation24_spill] sm:$0xff] %v3874_v53  ;;  %vm1155_vm0 = vcmp.eq.s32.totalorder %v3747_v9, %v1145_v48  ;;  %vm1159_vm1 = vcmp.eq.s32.totalorder %v3764_v49, %v1145_v48  ;;  %v1469_v1 = vrot.slane %v3864_v47, %v3767_v54  ;;  %vm1205_vm2 = vcmp.eq.s32.totalorder %v3747_v9, %v1195_v50 }
  0x86   : > { %v1163_v4 = vsel %vm1155_vm0, %v3813_v27, 0.0  ;;  %v1167_v5 = vsel %vm1159_vm1, %v3813_v27, 0.0  ;;  %vm1209_vm3 = vcmp.eq.s32.totalorder %v3764_v49, %v1195_v50  ;;  %v1369_v6 = vrot.slane %v1353_v51, %v3776_v61 }
  0x87   : > { %v1213_v7 = vadd.f32 %v1163_v4, %v3820_v30  ;;  %v1217_v14 = vadd.f32 %v1167_v5, %v3820_v30  ;;  %v1527_v15 = vrot.slane %v3871_v52, %v3767_v54  ;;  %v3896_v16 = vrot.slane %v980_v45, %v3776_v61 }
  0x88   : > { %v3899_v20 = vrot.slane %v1074_v55, %v3776_v61  ;;  %vm1263_vm4 = vcmp.eq.s32.totalorder %v3747_v9, %v1253_v57  ;;  %v1427_v23 = vrot.slane %v1411_v59, %v3776_v61  ;;  %vm1267_vm5 = vcmp.eq.s32.totalorder %v3764_v49, %v1253_v57 }
  0x89   : > { %5552 = vst [vmem:[#allocation25_spill] sm:$0xff] %v3896_v16  ;;  %v1221_v31 = vsel %vm1205_vm2, %v1213_v7, %v1163_v4  ;;  %v1225_v37 = vsel %vm1209_vm3, %v1217_v14, %v1167_v5  ;;  %v3905_v40 = vrot.slane %v1469_v1, %v3776_v61  ;;  %vm1321_vm6 = vcmp.eq.s32.totalorder %v3747_v9, %v1311_v63 }
  0x8a   : > { %5553 = vst [vmem:[#allocation26_spill] sm:$0xff] %v3899_v20  ;;  %v1271_v41 = vadd.f32 %v1221_v31, %v3825_v32  ;;  %v1275_v42 = vadd.f32 %v1225_v37, %v3825_v32  ;;  %v223_v45 = vsub.f32 1.0, %v3778_v62  ;;  %vm1325_vm7 = vcmp.eq.s32.totalorder %v3764_v49, %v1311_v63 }
  0x8b   : > { %vm1379_vm8 = vcmp.eq.s32.totalorder %v3747_v9, %v1369_v6  ;;  %vm1383_vm9 = vcmp.eq.s32.totalorder %v3764_v49, %v1369_v6  ;;  %v3915_v46 = vrot.slane %v1527_v15, %v3776_v61  ;;  %vm1437_vm10 = vcmp.eq.s32.totalorder %v3747_v9, %v1427_v23 }
  0x8c   : > { %v1279_v48 = vsel %vm1263_vm4, %v1271_v41, %v1221_v31  ;;  %v1283_v50 = vsel %vm1267_vm5, %v1275_v42, %v1225_v37  ;;  %vm1441_vm11 = vcmp.eq.s32.totalorder %v3764_v49, %v1427_v23  ;;  %vm1495_vm12 = vcmp.eq.s32.totalorder %v3747_v9, %v3905_v40 }
  0x8d   : > { %v1329_v51 = vadd.f32 %v1279_v48, %v3837_v36  ;;  %v1333_v55 = vadd.f32 %v1283_v50, %v3837_v36  ;;  %vm1499_vm13 = vcmp.eq.s32.totalorder %v3764_v49, %v3905_v40  ;;  %v227_v57 = vmul.f32 %v3751_v12, %v3778_v62 }
  0x8e   : > { %v235_v59 = vmul.f32 %v3755_v18, %v3778_v62  ;;  %v3930_v1 = vmul.f32 %v3751_v12, %v223_v45  ;;  %v239_v4 = vmul.u32 19349663, %v3782_v2  ;;  %v245_v5 = vmul.f32 %v3757_v19, %v3778_v62 }
  0x8f   : > { %v247_v7 = vmul.f32 %v3757_v19, %v223_v45  ;;  %v1337_v14 = vsel %vm1321_vm6, %v1329_v51, %v1279_v48  ;;  %v1341_v15 = vsel %vm1325_vm7, %v1333_v55, %v1283_v50  ;;  %v249_v31 = vmul.u32 83492791, %v3782_v2 }
  0x90   : > { %v264_v37 = vrot.slane %v235_v59, 5  ;;  %v1387_v41 = vadd.f32 %v1337_v14, %v3857_v44  ;;  %v1391_v12 = vadd.f32 %v1341_v15, %v3857_v44  ;;  %vm1553_vm14 = vcmp.eq.s32.totalorder %v3747_v9, %v3915_v46 }
  0x91   : > { %v237_v62 = vmul.f32 %v3755_v18, %v223_v45  ;;  %v254_v42 = vrot.slane %v239_v4, 5  ;;  %v241_v19 = vadd.s32 19349663, %v239_v4  ;;  %v251_v11 = vadd.s32 83492791, %v249_v31 }
  0x92   : > { %v265_v29 = vrot.slane %v264_v37, 4  ;;  %v282_v48 = vrot.slane %v245_v5, 6  ;;  %v1395_v63 = vsel %vm1379_vm8, %v1387_v41, %v1337_v14  ;;  %v1399_v50 = vsel %vm1383_vm9, %v1391_v12, %v1341_v15 }
  0x93   : > { %v255_v51 = vrot.slane %v254_v42, 4  ;;  %v272_v55 = vrot.slane %v249_v31, 6  ;;  %v1445_v59 = vadd.f32 %v1395_v63, %v3874_v53  ;;  %v1449_v44 = vadd.f32 %v1399_v50, %v3874_v53 }
  0x94   : > { %v231_v28 = vadd.s32 1, %v3782_v2  ;;  %v300_v18 = vrot.slane %v247_v7, 6  ;;  %v269_v4 = vmul.f32 %v265_v29, %v227_v57  ;;  %v283_v37 = vrot.slane %v282_v48, 4 }
  0x95   : > { %v257_v45 = vxor.u32 %v3782_v2, %v255_v51  ;;  %v290_v5 = vrot.slane %v251_v11, 6  ;;  %v1453_v14 = vsel %vm1437_vm10, %v1445_v59, %v1395_v63  ;;  %v1457_v6 = vsel %vm1441_vm11, %v1449_v44, %v1399_v50 }
  0x96   : > { %v308_v15 = vrot.slane %v241_v19, 5  ;;  %v318_v31 = vrot.slane %v237_v62, 5  ;;  %v1503_v41 = vadd.f32 %v1453_v14, %v3896_v16  ;;  %v1507_v12 = vadd.f32 %v1457_v6, %v3896_v16 }
  0x97   : > { %v259_v42 = vand.u32 63, %v257_v45  ;;  %v273_v53 = vrot.slane %v272_v55, 4  ;;  %vm1557_vm15 = vcmp.eq.s32.totalorder %v3764_v49, %v3915_v46  ;;  %v291_v7 = vrot.slane %v290_v5, 4 }
  0x98   : > { %v309_v48 = vrot.slane %v308_v15, 4  ;;  %v319_v11 = vrot.slane %v318_v31, 4  ;;  %v1511_v63 = vsel %vm1495_vm12, %v1503_v41, %v1453_v14  ;;  %v1515_v44 = vsel %vm1499_vm13, %v1507_v12, %v1457_v6 }
  0x99   : > { %v301_v23 = vrot.slane %v300_v18, 4  ;;  %v337_v62 = vxor.u32 %v255_v51, %v231_v28  ;;  %v1561_v19 = vadd.f32 %v1511_v63, %v3899_v20  ;;  %v1565_v50 = vadd.f32 %v1515_v44, %v3899_v20 }
  0x9a   : > { %v3970_v55 = vmul.f32 %v283_v37, %v269_v4  ;;  %v311_v59 = vxor.u32 %v3782_v2, %v309_v48  ;;  %v275_v45 = vxor.u32 %v273_v53, %v259_v42  ;;  %v323_v5 = vmul.f32 %v319_v11, %v227_v57 }
  0x9b   : > { %v339_v15 = vand.u32 63, %v337_v62  ;;  %v341_v31 = vmul.f32 %v265_v29, %v3930_v1  ;;  %v1569_v40 = vsel %vm1553_vm14, %v1561_v19, %v1511_v63  ;;  %v1573_v51 = vsel %vm1557_vm15, %v1565_v50, %v1515_v44 }
  0x9c   : > { %v293_v18 = vxor.u32 %v291_v7, %v259_v42  ;;  %v313_v14 = vand.u32 63, %v311_v59  ;;  %v3269_v41 = vpack.c.bf16 %v1573_v51, %v1569_v40  ;;  %v3982_v2 = vmul.f32 %v301_v23, %v269_v4 }
  0x9d   : > { %v343_v57 = vxor.u32 %v339_v15, %v273_v53  ;;  %v3984_v62 = vmul.f32 %v323_v5, %v283_v37  ;;  %v3986_v20 = vmul.f32 %v323_v5, %v301_v23  ;;  %v3988_v63 = vmul.f32 %v341_v31, %v283_v37 }
  0x9e   : > { %v325_v12 = vxor.u32 %v313_v14, %v273_v53  ;;  %v331_v29 = vxor.u32 %v313_v14, %v291_v7  ;;  %3270 = vmatprep.subr.bf16.mxu0 %v3269_v41  ;;  %v349_v46 = vxor.u32 %v339_v15, %v291_v7  ;;  %v355_v44 = vxor.u32 %v309_v48, %v231_v28 }
  0x9f   : > { %v359_v42 = vmul.f32 %v319_v11, %v3930_v1  ;;  %v3991_v19 = vand.u32 63, %v275_v45  ;;  %v3993_v50 = vand.u32 63, %v293_v18  ;;  %v3995_v4 = vand.u32 63, %v343_v57 }
  0xa0   : > { %v432_v59 = vrot.slane %v3970_v55, %v3767_v54  ;;  %v3999_v40 = vand.u32 63, %v325_v12  ;;  %v4001_v5 = vmul.f32 %v341_v31, %v301_v23  ;;  %v357_v51 = vand.u32 63, %v355_v44 }
  0xa1   : > { %5554 = vst [vmem:[#allocation27_spill] sm:$0xff] %v3991_v19  ;;  %5555 = vst [vmem:[#allocation28_spill] sm:$0xff] %v3993_v50  ;;  %v518_v15 = vrot.slane %v3982_v2, %v3767_v54  ;;  %v4005_v28 = vand.u32 63, %v331_v29  ;;  %v4007_v1 = vmul.f32 %v359_v42, %v283_v37  ;;  %v612_v48 = vrot.slane %v3984_v62, %v3767_v54 }
  0xa2   : > { %5556 = vst [vmem:[#allocation29_spill] sm:$0xff] %v3995_v4  ;;  %5557 = vst [vmem:[#allocation30_spill] sm:$0xff] %v3999_v40  ;;  %v706_v11 = vrot.slane %v3986_v20, %v3767_v54  ;;  %v4013_v45 = vand.u32 63, %v349_v46  ;;  %v361_v18 = vxor.u32 %v357_v51, %v273_v53  ;;  %v367_v14 = vxor.u32 %v357_v51, %v291_v7 }
  0xa3   : > { %5558 = vst [vmem:[#allocation31_spill] sm:$0xff] %v4005_v28  ;;  %v800_v31 = vrot.slane %v3988_v63, %v3767_v54  ;;  %v4017_v41 = vmul.f32 %v359_v42, %v301_v23  ;;  %v4020_v57 = vrot.slane %v432_v59, %v3776_v61  ;;  %v4023_v37 = vrot.slane %v518_v15, %v3776_v61 }
  0xa4   : > { %5559 = vst [vmem:[#allocation32_spill] sm:$0xff] %v4013_v45  ;;  %v4027_v29 = vand.u32 63, %v361_v18  ;;  %v4030_v46 = vrot.slane %v612_v48, %v3776_v61  ;;  %v4033_v53 = vrot.slane %v706_v11, %v3776_v61  ;;  %v894_v7 = vrot.slane %v4001_v5, %v3767_v54 }
  0xa5   : > { %5560 = vst [vmem:[#allocation33_spill] sm:$0xff] %v4020_v57  ;;  %5561 = vst [vmem:[#allocation34_spill] sm:$0xff] %v4023_v37  ;;  %v4037_v23 = vand.u32 63, %v367_v14  ;;  %v988_v44 = vrot.slane %v4007_v1, %v3767_v54  ;;  %v4042_v42 = vadd.s32 4294967280, %v3991_v19  ;;  %v4045_v59 = vadd.s32 4294967280, %v3993_v50 }
  0xa6   : > { %5562 = vst [vmem:[#allocation35_spill] sm:$0xff] %v4027_v29  ;;  %5563 = vst [vmem:[#allocation36_spill] sm:$0xff] %v4030_v46  ;;  %v4048_v51 = vrot.slane %v800_v31, %v3776_v61  ;;  %v4051_v15 = vadd.s32 4294967280, %v3999_v40  ;;  %v4054_v48 = vadd.s32 4294967280, %v4005_v28  ;;  %v4057_v11 = vadd.s32 4294967280, %v3995_v4 }
  0xa7   : > { %5564 = vst [vmem:[#allocation37_spill] sm:$0xff] %v4033_v53  ;;  %5565 = vst [vmem:[#allocation38_spill] sm:$0xff] %v4037_v23  ;;  %v1137_v18 = vrot.slane %v4042_v42, %v3767_v54  ;;  %v1187_v14 = vrot.slane %v4045_v59, %v3767_v54  ;;  %v4064_v12 = vadd.s32 4294967280, %v4013_v45  ;;  %v4067_v31 = vadd.s32 4294967280, %v4027_v29 }
  0xa8   : > { %5566 = vst [vmem:[#allocation39_spill] sm:$0xff] %v4048_v51  ;;  %v1082_v6 = vrot.slane %v4017_v41, %v3767_v54  ;;  %v1245_v16 = vrot.slane %v4051_v15, %v3767_v54  ;;  %v1303_v4 = vrot.slane %v4054_v48, %v3767_v54  ;;  %v1361_v28 = vrot.slane %v4057_v11, %v3767_v54 }
  0xa9   : > { %v4078_v40 = vrot.slane %v894_v7, %v3776_v61  ;;  %v1153_v45 = vrot.slane %v1137_v18, %v3776_v61  ;;  %v1203_v29 = vrot.slane %v1187_v14, %v3776_v61  ;;  %v4083_v50 = vadd.s32 4294967280, %v4037_v23 }
  0xaa   : > { %v4086_v19 = vrot.slane %v988_v44, %v3776_v61  ;;  %v1261_v36 = vrot.slane %v1245_v16, %v3776_v61  ;;  %v1319_v24 = vrot.slane %v1303_v4, %v3776_v61  ;;  %v1419_v32 = vrot.slane %v4064_v12, %v3767_v54 }
  0xab   : > { %5567 = vst [vmem:[#allocation40_spill] sm:$0xff] %v4078_v40  ;;  %vm1157_vm0 = vcmp.eq.s32.totalorder %v3747_v9, %v1153_v45  ;;  %vm1161_vm1 = vcmp.eq.s32.totalorder %v3764_v49, %v1153_v45  ;;  %v1377_v7 = vrot.slane %v1361_v28, %v3776_v61  ;;  %v1477_v18 = vrot.slane %v4067_v31, %v3767_v54 }
  0xac   : > { %5568 = vst [vmem:[#allocation41_spill] sm:$0xff] %v4086_v19  ;;  %v1165_v14 = vsel %vm1157_vm0, %v4020_v57, 0.0  ;;  %v1169_v44 = vsel %vm1161_vm1, %v4020_v57, 0.0  ;;  %vm1207_vm2 = vcmp.eq.s32.totalorder %v3747_v9, %v1203_v29  ;;  %vm1211_vm3 = vcmp.eq.s32.totalorder %v3764_v49, %v1203_v29 }
  0xad   : > { %v4102_v16 = vrot.slane %v1082_v6, %v3776_v61  ;;  %v1215_v4 = vadd.f32 %v1165_v14, %v4023_v37  ;;  %v1219_v45 = vadd.f32 %v1169_v44, %v4023_v37  ;;  %v1535_v28 = vrot.slane %v4083_v50, %v3767_v54 }
  0xae   : > { %vm1265_vm4 = vcmp.eq.s32.totalorder %v3747_v9, %v1261_v36  ;;  %vm1269_vm5 = vcmp.eq.s32.totalorder %v3764_v49, %v1261_v36  ;;  %vm1323_vm6 = vcmp.eq.s32.totalorder %v3747_v9, %v1319_v24  ;;  %v1435_v23 = vrot.slane %v1419_v32, %v3776_v61 }
  0xaf   : > { %v1223_v57 = vsel %vm1207_vm2, %v1215_v4, %v1165_v14  ;;  %v1227_v29 = vsel %vm1211_vm3, %v1219_v45, %v1169_v44  ;;  %v4113_v6 = vrot.slane %v1477_v18, %v3776_v61  ;;  %v420_v17 = vrot.slane %v3769_v56, %v3776_v61 }
  0xb0   : > { %v1273_v37 = vadd.f32 %v1223_v57, %v4030_v46  ;;  %v1277_v30 = vadd.f32 %v1227_v29, %v4030_v46  ;;  %vm1327_vm7 = vcmp.eq.s32.totalorder %v3764_v49, %v1319_v24  ;;  %vm1381_vm8 = vcmp.eq.s32.totalorder %v3747_v9, %v1377_v7 }
  0xb1   : > { %vm1385_vm9 = vcmp.eq.s32.totalorder %v3764_v49, %v1377_v7  ;;  %vm1439_vm10 = vcmp.eq.s32.totalorder %v3747_v9, %v1435_v23  ;;  %vm1443_vm11 = vcmp.eq.s32.totalorder %v3764_v49, %v1435_v23  ;;  %v4125_v32 = vrot.slane %v1535_v28, %v3776_v61 }
  0xb2   : > { %v1281_v56 = vsel %vm1265_vm4, %v1273_v37, %v1223_v57  ;;  %v1285_v18 = vsel %vm1269_vm5, %v1277_v30, %v1227_v29  ;;  %v4132_v14 = vrot.slane %v420_v17, %v3776_v61  ;;  %v506_v44 = vrot.slane %v3771_v58, %v3776_v61 }
  0xb3   : > { %v1331_v4 = vadd.f32 %v1281_v56, %v4033_v53  ;;  %v1335_v45 = vadd.f32 %v1285_v18, %v4033_v53  ;;  %vm1497_vm12 = vcmp.eq.s32.totalorder %v3747_v9, %v4113_v6  ;;  %vm1501_vm13 = vcmp.eq.s32.totalorder %v3764_v49, %v4113_v6 }
  0xb4   : > { %5569 = vst [vmem:[#allocation42_spill] sm:$0xff] %v4132_v14  ;;  %v5570_v30 = vrot.slane %v3773_v60, %v3776_v61  ;;  %v694_v17 = vrot.slane %v3780_v0, %v3776_v61  ;;  %v4151_v58 = vrot.slane %v506_v44, %v3776_v61  ;;  %v788_v57 = vrot.slane %v3784_v3, %v3776_v61 }
  0xb5   : > { %v882_v37 = vrot.slane %v3802_v22, %v3776_v61  ;;  %v976_v28 = vrot.slane %v3808_v25, %v3776_v61  ;;  %v1339_v60 = vsel %vm1323_vm6, %v1331_v4, %v1281_v56  ;;  %v1343_v29 = vsel %vm1327_vm7, %v1335_v45, %v1285_v18 }
  0xb6   : > { %v4146_v36 = vrot.slane %v5570_v30, %v3776_v61  ;;  %5571 = vst [vmem:[#allocation43_spill] sm:$0xff] %v4151_v58  ;;  %v4164_v0 = vrot.slane %v694_v17, %v3776_v61  ;;  %v1070_v44 = vrot.slane %v3810_v26, %v3776_v61  ;;  %v1389_v3 = vadd.f32 %v1339_v60, %v4048_v51 }
  0xb7   : > { %v1393_v30 = vadd.f32 %v1343_v29, %v4048_v51  ;;  %vm1555_vm14 = vcmp.eq.s32.totalorder %v3747_v9, %v4125_v32  ;;  %vm1559_vm15 = vcmp.eq.s32.totalorder %v3764_v49, %v4125_v32  ;;  %v4175_v22 = vrot.slane %v788_v57, %v3776_v61 }
  0xb8   : > { %v4178_v24 = vrot.slane %v882_v37, %v3776_v61  ;;  %v4181_v25 = vrot.slane %v976_v28, %v3776_v61  ;;  %v4184_v26 = vrot.slane %v1070_v44, %v3776_v61  ;;  %v1125_v56 = vrot.slane %v3828_v33, %v3776_v61 }
  0xb9   : > { %v1175_v18 = vrot.slane %v3831_v34, %v3776_v61  ;;  %v1397_v4 = vsel %vm1381_vm8, %v1389_v3, %v1339_v60  ;;  %v1401_v45 = vsel %vm1385_vm9, %v1393_v30, %v1343_v29  ;;  %v1233_v17 = vrot.slane %v3834_v35, %v3776_v61 }
  0xba   : > { %v1291_v57 = vrot.slane %v3842_v38, %v3776_v61  ;;  %v1447_v37 = vadd.f32 %v1397_v4, %v4078_v40  ;;  %v1451_v28 = vadd.f32 %v1401_v45, %v4078_v40  ;;  %v1141_v33 = vrot.slane %v1125_v56, %v3776_v61 }
  0xbb   : > { %v1191_v34 = vrot.slane %v1175_v18, %v3776_v61  ;;  %v1249_v44 = vrot.slane %v1233_v17, %v3776_v61  ;;  %v1349_v7 = vrot.slane %v3845_v39, %v3776_v61  ;;  %v1407_v35 = vrot.slane %v3854_v43, %v3776_v61 }
  0xbc   : > { %v1307_v60 = vrot.slane %v1291_v57, %v3776_v61  ;;  %v1455_v38 = vsel %vm1439_vm10, %v1447_v37, %v1397_v4  ;;  %v1459_v29 = vsel %vm1443_vm11, %v1451_v28, %v1401_v45  ;;  %vm1154_vm0 = vcmp.eq.s32.totalorder %v3747_v9, %v1141_v33 }
  0xbd   : > { %vm1158_vm1 = vcmp.eq.s32.totalorder %v3764_v49, %v1141_v33  ;;  %v1505_v3 = vadd.f32 %v1455_v38, %v4086_v19  ;;  %v1509_v30 = vadd.f32 %v1459_v29, %v4086_v19  ;;  %v1162_v56 = vsel %vm1154_vm0, %v4132_v14, 0.0 }
  0xbe   : > { %v1166_v39 = vsel %vm1158_vm1, %v4132_v14, 0.0  ;;  %vm1204_vm2 = vcmp.eq.s32.totalorder %v3747_v9, %v1191_v34  ;;  %vm1208_vm3 = vcmp.eq.s32.totalorder %v3764_v49, %v1191_v34  ;;  %v1212_v43 = vadd.f32 %v1162_v56, %v4151_v58 }
  0xbf   : > { %v1216_v23 = vadd.f32 %v1166_v39, %v4151_v58  ;;  %v1513_v18 = vsel %vm1497_vm12, %v1505_v3, %v1455_v38  ;;  %v1517_v4 = vsel %vm1501_vm13, %v1509_v30, %v1459_v29  ;;  %vm1262_vm4 = vcmp.eq.s32.totalorder %v3747_v9, %v1249_v44 }
  0xc0   : > { %vm1266_vm5 = vcmp.eq.s32.totalorder %v3764_v49, %v1249_v44  ;;  %v1563_v45 = vadd.f32 %v1513_v18, %v4102_v16  ;;  %v1567_v17 = vadd.f32 %v1517_v4, %v4102_v16  ;;  %v1220_v57 = vsel %vm1204_vm2, %v1212_v43, %v1162_v56 }
  0xc1   : > { %v1224_v37 = vsel %vm1208_vm3, %v1216_v23, %v1166_v39  ;;  %v1270_v28 = vadd.f32 %v1220_v57, %v4146_v36  ;;  %vm1320_vm6 = vcmp.eq.s32.totalorder %v3747_v9, %v1307_v60  ;;  %vm1324_vm7 = vcmp.eq.s32.totalorder %v3764_v49, %v1307_v60 }
  0xc2   : > { %v1274_v33 = vadd.f32 %v1224_v37, %v4146_v36  ;;  %v1571_v6 = vsel %vm1555_vm14, %v1563_v45, %v1513_v18  ;;  %v1575_v34 = vsel %vm1559_vm15, %v1567_v17, %v1517_v4  ;;  %v1365_v44 = vrot.slane %v1349_v7, %v3776_v61 }
  0xc3   : > { %v1423_v38 = vrot.slane %v1407_v35, %v3776_v61  ;;  %v3273_v29 = vpack.c.bf16 %v1575_v34, %v1571_v6  ;;  %v1278_v3 = vsel %vm1262_vm4, %v1270_v28, %v1220_v57  ;;  %v1465_v56 = vrot.slane %v3864_v47, %v3776_v61 }
  0xc4   : > { %v1282_v30 = vsel %vm1266_vm5, %v1274_v33, %v1224_v37  ;;  %v1328_v39 = vadd.f32 %v1278_v3, %v4164_v0  ;;  %vm1378_vm8 = vcmp.eq.s32.totalorder %v3747_v9, %v1365_v44  ;;  %vm1382_vm9 = vcmp.eq.s32.totalorder %v3764_v49, %v1365_v44 }
  0xc5   : > { %v1332_v43 = vadd.f32 %v1282_v30, %v4164_v0  ;;  %3274 = vmatprep.subr.bf16.mxu1 %v3273_v29  ;;  %vm1436_vm10 = vcmp.eq.s32.totalorder %v3747_v9, %v1423_v38  ;;  %vm1440_vm11 = vcmp.eq.s32.totalorder %v3764_v49, %v1423_v38  ;;  %v1481_v32 = vrot.slane %v1465_v56, %v3776_v61 }
  0xc6   : > { %v1523_v7 = vrot.slane %v3871_v52, %v3776_v61  ;;  %v1336_v47 = vsel %vm1320_vm6, %v1328_v39, %v1278_v3  ;;  %v428_v23 = vrot.slane %v3970_v55, %v3776_v61  ;;  %v514_v18 = vrot.slane %v3982_v2, %v3776_v61 }
  0xc7   : > { %v1340_v35 = vsel %vm1324_vm7, %v1332_v43, %v1282_v30  ;;  %v1386_v4 = vadd.f32 %v1336_v47, %v4175_v22  ;;  %vm1494_vm12 = vcmp.eq.s32.totalorder %v3747_v9, %v1481_v32  ;;  %vm1498_vm13 = vcmp.eq.s32.totalorder %v3764_v49, %v1481_v32 }
  0xc8   : > { %v1390_v45 = vadd.f32 %v1340_v35, %v4175_v22  ;;  %v1539_v52 = vrot.slane %v1523_v7, %v3776_v61  ;;  %v4269_v17 = vrot.slane %v428_v23, %v3776_v61  ;;  %v4272_v60 = vrot.slane %v514_v18, %v3776_v61 }
  0xc9   : > { %v5572_v55 = vrot.slane %v3984_v62, %v3776_v61  ;;  %v1394_v57 = vsel %vm1378_vm8, %v1386_v4, %v1336_v47  ;;  %v702_v28 = vrot.slane %v3986_v20, %v3776_v61  ;;  %v796_v33 = vrot.slane %v3988_v63, %v3776_v61 }
  0xca   : > { %v1398_v37 = vsel %vm1382_vm9, %v1390_v45, %v1340_v35  ;;  %v1444_v6 = vadd.f32 %v1394_v57, %v4178_v24  ;;  %vm1552_vm14 = vcmp.eq.s32.totalorder %v3747_v9, %v1539_v52  ;;  %vm1556_vm15 = vcmp.eq.s32.totalorder %v3764_v49, %v1539_v52 }
  0xcb   : > { %v4278_v2 = vrot.slane %v5572_v55, %v3776_v61  ;;  %v1448_v34 = vadd.f32 %v1398_v37, %v4178_v24  ;;  %v4293_v62 = vrot.slane %v702_v28, %v3776_v61  ;;  %v4296_v44 = vrot.slane %v796_v33, %v3776_v61 }
  0xcc   : > { %v890_v20 = vrot.slane %v4001_v5, %v3776_v61  ;;  %v984_v63 = vrot.slane %v4007_v1, %v3776_v61  ;;  %v1452_v29 = vsel %vm1436_vm10, %v1444_v6, %v1394_v57  ;;  %v1078_v30 = vrot.slane %v4017_v41, %v3776_v61 }
  0xcd   : > { %v1456_v3 = vsel %vm1440_vm11, %v1448_v34, %v1398_v37  ;;  %v1133_v56 = vrot.slane %v4042_v42, %v3776_v61  ;;  %v1502_v39 = vadd.f32 %v1452_v29, %v4181_v25  ;;  %v1183_v41 = vrot.slane %v4045_v59, %v3776_v61 }
  0xce   : > { %v1506_v43 = vadd.f32 %v1456_v3, %v4181_v25  ;;  %v4313_v5 = vrot.slane %v890_v20, %v3776_v61  ;;  %v4316_v1 = vrot.slane %v984_v63, %v3776_v61  ;;  %v4319_v7 = vrot.slane %v1078_v30, %v3776_v61 }
  0xcf   : > { %v1149_v38 = vrot.slane %v1133_v56, %v3776_v61  ;;  %v1241_v42 = vrot.slane %v4051_v15, %v3776_v61  ;;  %v1510_v47 = vsel %vm1494_vm12, %v1502_v39, %v1452_v29  ;;  %v1299_v23 = vrot.slane %v4054_v48, %v3776_v61 }
  0xd0   : > { %5573 = vst [vmem:[#allocation44_spill] sm:$0xff] %v4319_v7  ;;  %v1514_v35 = vsel %vm1498_vm13, %v1506_v43, %v1456_v3  ;;  %v1357_v18 = vrot.slane %v4057_v11, %v3776_v61  ;;  %v1560_v4 = vadd.f32 %v1510_v47, %v4184_v26  ;;  %v1199_v32 = vrot.slane %v1183_v41, %v3776_v61 }
  0xd1   : > { %v1564_v45 = vadd.f32 %v1514_v35, %v4184_v26  ;;  %vm1156_vm0 = vcmp.eq.s32.totalorder %v3747_v9, %v1149_v38  ;;  %vm1160_vm1 = vcmp.eq.s32.totalorder %v3764_v49, %v1149_v38  ;;  %v1257_v55 = vrot.slane %v1241_v42, %v3776_v61 }
  0xd2   : > { %v1164_v59 = vsel %vm1156_vm0, %v4269_v17, 0.0  ;;  %v1168_v15 = vsel %vm1160_vm1, %v4269_v17, 0.0  ;;  %v1568_v48 = vsel %vm1552_vm14, %v1560_v4, %v1510_v47  ;;  %vm1206_vm2 = vcmp.eq.s32.totalorder %v3747_v9, %v1199_v32 }
  0xd3   : > { %v1572_v11 = vsel %vm1556_vm15, %v1564_v45, %v1514_v35  ;;  %v1214_v57 = vadd.f32 %v1164_v59, %v4272_v60  ;;  %v1218_v37 = vadd.f32 %v1168_v15, %v4272_v60  ;;  %vm1210_vm3 = vcmp.eq.s32.totalorder %v3764_v49, %v1199_v32 }
  0xd4   : > { %v3271_v28 = vpack.c.bf16 %v1572_v11, %v1568_v48  ;;  %vm1264_vm4 = vcmp.eq.s32.totalorder %v3747_v9, %v1257_v55  ;;  %vm1268_vm5 = vcmp.eq.s32.totalorder %v3764_v49, %v1257_v55  ;;  %v1315_v34 = vrot.slane %v1299_v23, %v3776_v61 }
  0xd5   : > { %v1222_v33 = vsel %vm1206_vm2, %v1214_v57, %v1164_v59  ;;  %v1226_v6 = vsel %vm1210_vm3, %v1218_v37, %v1168_v15  ;;  %v1373_v63 = vrot.slane %v1357_v18, %v3776_v61  ;;  %v1415_v29 = vrot.slane %v4064_v12, %v3776_v61 }
  0xd6   : > { %3272 = vmatpush1.bf16.msra.mxu0 %v3271_v28  ;;  %v1272_v52 = vadd.f32 %v1222_v33, %v4278_v2  ;;  %v1276_v20 = vadd.f32 %v1226_v6, %v4278_v2  ;;  %vm1322_vm6 = vcmp.eq.s32.totalorder %v3747_v9, %v1315_v34  ;;  %vm1326_vm7 = vcmp.eq.s32.totalorder %v3764_v49, %v1315_v34  ;;  %v5574_v34 = vld [vmem:[#allocation20_spill] sm:$0xff] }
  0xd7   : > { %v1473_v3 = vrot.slane %v4067_v31, %v3776_v61  ;;  %v1531_v30 = vrot.slane %v4083_v50, %v3776_v61  ;;  %vm1380_vm8 = vcmp.eq.s32.totalorder %v3747_v9, %v1373_v63  ;;  %vm1384_vm9 = vcmp.eq.s32.totalorder %v3764_v49, %v1373_v63 }
  0xd8   : > { %v1280_v56 = vsel %vm1264_vm4, %v1272_v52, %v1222_v33  ;;  %v1284_v39 = vsel %vm1268_vm5, %v1276_v20, %v1226_v6  ;;  %v1431_v38 = vrot.slane %v1415_v29, %v3776_v61  ;;  %v382_v31 = vrot.slane %v3786_v8, %v3767_v54 }
  0xd9   : > { %v1330_v43 = vadd.f32 %v1280_v56, %v4293_v62  ;;  %v1334_v12 = vadd.f32 %v1284_v39, %v4293_v62  ;;  %v1489_v41 = vrot.slane %v1473_v3, %v3776_v61  ;;  %v1547_v42 = vrot.slane %v1531_v30, %v3776_v61 }
  0xda   : > { %v468_v50 = vrot.slane %v3788_v13, %v3767_v54  ;;  %v562_v47 = vrot.slane %v3794_v10, %v3767_v54  ;;  %vm1438_vm10 = vcmp.eq.s32.totalorder %v3747_v9, %v1431_v38  ;;  %vm1442_vm11 = vcmp.eq.s32.totalorder %v3764_v49, %v1431_v38 }
  0xdb   : > { %v1338_v35 = vsel %vm1322_vm6, %v1330_v43, %v1280_v56  ;;  %v1342_v23 = vsel %vm1326_vm7, %v1334_v12, %v1284_v39  ;;  %vm1496_vm12 = vcmp.eq.s32.totalorder %v3747_v9, %v1489_v41  ;;  %vm1500_vm13 = vcmp.eq.s32.totalorder %v3764_v49, %v1489_v41  ;;  %v5575_v39 = vld [vmem:[#allocation15_spill] sm:$0xff] }
  0xdc   : > { %v1388_v18 = vadd.f32 %v1338_v35, %v4296_v44  ;;  %v1392_v4 = vadd.f32 %v1342_v23, %v4296_v44  ;;  %vm1554_vm14 = vcmp.eq.s32.totalorder %v3747_v9, %v1547_v42  ;;  %vm1558_vm15 = vcmp.eq.s32.totalorder %v3764_v49, %v1547_v42 }
  0xdd   : > { %v398_v45 = vrot.slane %v382_v31, %v3776_v61  ;;  %v484_v59 = vrot.slane %v468_v50, %v3776_v61  ;;  %v578_v55 = vrot.slane %v562_v47, %v3776_v61  ;;  %v656_v48 = vrot.slane %v3798_v21, %v3767_v54  ;;  %v5576_v31 = vld [vmem:[#allocation21_spill] sm:$0xff] }
  0xde   : > { %v1396_v15 = vsel %vm1380_vm8, %v1388_v18, %v1338_v35  ;;  %v1400_v32 = vsel %vm1384_vm9, %v1392_v4, %v1342_v23  ;;  %v750_v43 = vrot.slane %v5575_v39, %v3767_v54 }
  0xdf   : > { %v1446_v11 = vadd.f32 %v1396_v15, %v4313_v5  ;;  %v1450_v57 = vadd.f32 %v1400_v32, %v4313_v5  ;;  %vm408_vm0 = vcmp.eq.s32.totalorder %v3747_v9, %v398_v45  ;;  %vm412_vm1 = vcmp.eq.s32.totalorder %v3764_v49, %v398_v45 }
  0xe0   : > { %v454_v37 = vsel %vm408_vm0, %v3813_v27, 0.0  ;;  %v458_v28 = vsel %vm412_vm1, %v3813_v27, 0.0  ;;  %vm494_vm2 = vcmp.eq.s32.totalorder %v3747_v9, %v484_v59  ;;  %vm498_vm3 = vcmp.eq.s32.totalorder %v3764_v49, %v484_v59  ;;  %v5577_v59 = vld [vmem:[#allocation16_spill] sm:$0xff] }
  0xe1   : > { %v1454_v33 = vsel %vm1438_vm10, %v1446_v11, %v1396_v15  ;;  %v1458_v6 = vsel %vm1442_vm11, %v1450_v57, %v1400_v32  ;;  %v540_v52 = vadd.f32 %v5574_v34, %v454_v37  ;;  %v544_v20 = vadd.f32 %v5574_v34, %v458_v28 }
  0xe2   : > { %v1504_v63 = vadd.f32 %v1454_v33, %v4316_v1  ;;  %v1508_v29 = vadd.f32 %v1458_v6, %v4316_v1  ;;  %vm588_vm4 = vcmp.eq.s32.totalorder %v3747_v9, %v578_v55  ;;  %vm592_vm5 = vcmp.eq.s32.totalorder %v3764_v49, %v578_v55  ;;  %v5578_v55 = vld [vmem:[#allocation22_spill] sm:$0xff] }
  0xe3   : > { %v548_v3 = vsel %vm494_vm2, %v540_v52, %v454_v37  ;;  %v552_v30 = vsel %vm498_vm3, %v544_v20, %v458_v28  ;;  %v672_v56 = vrot.slane %v656_v48, %v3776_v61  ;;  %v766_v45 = vrot.slane %v750_v43, %v3776_v61  ;;  %v5580_v20 = vld [vmem:[#allocation19_spill] sm:$0xff] }
  0xe4   : > { %v1512_v12 = vsel %vm1496_vm12, %v1504_v63, %v1454_v33  ;;  %v1516_v38 = vsel %vm1500_vm13, %v1508_v29, %v1458_v6  ;;  %v634_v50 = vadd.f32 %v5576_v31, %v548_v3  ;;  %v638_v47 = vadd.f32 %v5576_v31, %v552_v30  ;;  %v5579_v6 = vld [vmem:[#allocation18_spill] sm:$0xff]  ;;  %v5581_v63 = vld [vmem:[#allocation23_spill] sm:$0xff] }
  0xe5   : > { %v1562_v35 = vadd.f32 %v1512_v12, %v4319_v7  ;;  %v1566_v23 = vadd.f32 %v1516_v38, %v4319_v7  ;;  %vm682_vm6 = vcmp.eq.s32.totalorder %v3747_v9, %v672_v56  ;;  %vm686_vm7 = vcmp.eq.s32.totalorder %v3764_v49, %v672_v56  ;;  %v5582_v43 = vld [vmem:[#allocation27_spill] sm:$0xff] }
  0xe6   : > { %v642_v18 = vsel %vm588_vm4, %v634_v50, %v548_v3  ;;  %v646_v4 = vsel %vm592_vm5, %v638_v47, %v552_v30  ;;  %v844_v41 = vrot.slane %v5577_v59, %v3767_v54  ;;  %vm776_vm8 = vcmp.eq.s32.totalorder %v3747_v9, %v766_v45 }
  0xe7   : > { %v1570_v15 = vsel %vm1554_vm14, %v1562_v35, %v1512_v12  ;;  %v1574_v32 = vsel %vm1558_vm15, %v1566_v23, %v1516_v38  ;;  %v728_v48 = vadd.f32 %v5578_v55, %v642_v18  ;;  %v732_v11 = vadd.f32 %v5578_v55, %v646_v4  ;;  %v5583_v38 = vld [vmem:[#allocation28_spill] sm:$0xff]  ;;  %v5584_v23 = vld [vmem:[#allocation30_spill] sm:$0xff] }
  0xe8   : > { %v3275_v57 = vpack.c.bf16 %v1574_v32, %v1570_v15  ;;  %vm780_vm9 = vcmp.eq.s32.totalorder %v3764_v49, %v766_v45  ;;  %v860_v37 = vrot.slane %v844_v41, %v3776_v61  ;;  %v938_v52 = vrot.slane %v5579_v6, %v3767_v54  ;;  %v5586_v15 = vld [vmem:[#allocation24_spill] sm:$0xff] }
  0xe9   : > { %v736_v28 = vsel %vm682_vm6, %v728_v48, %v642_v18  ;;  %v740_v33 = vsel %vm686_vm7, %v732_v11, %v646_v4  ;;  %v1032_v42 = vrot.slane %v5580_v20, %v3767_v54  ;;  %v390_v12 = vrot.slane %v5582_v43, %v3767_v54  ;;  %v5585_v4 = vld [vmem:[#allocation31_spill] sm:$0xff] }
  0xea   : > { %3276 = vmatpush1.bf16.msra.mxu1 %v3275_v57  ;;  %v822_v29 = vadd.f32 %v5581_v63, %v736_v28  ;;  %v826_v3 = vadd.f32 %v5581_v63, %v740_v33  ;;  %vm870_vm10 = vcmp.eq.s32.totalorder %v3747_v9, %v860_v37  ;;  %vm874_vm11 = vcmp.eq.s32.totalorder %v3764_v49, %v860_v37 }
  0xeb   : > { %v954_v30 = vrot.slane %v938_v52, %v3776_v61  ;;  %v1048_v56 = vrot.slane %v1032_v42, %v3776_v61  ;;  %v476_v50 = vrot.slane %v5583_v38, %v3767_v54  ;;  %v570_v18 = vrot.slane %v5584_v23, %v3767_v54  ;;  %v5587_v42 = vld [vmem:[#allocation25_spill] sm:$0xff] }
  0xec   : > { %v830_v47 = vsel %vm776_vm8, %v822_v29, %v736_v28  ;;  %v834_v35 = vsel %vm780_vm9, %v826_v3, %v740_v33  ;;  %v664_v41 = vrot.slane %v5585_v4, %v3767_v54  ;;  %v406_v45 = vrot.slane %v390_v12, %v3776_v61  ;;  %v5588_v12 = vld [vmem:[#allocation33_spill] sm:$0xff] }
  0xed   : > { %v916_v32 = vadd.f32 %v5586_v15, %v830_v47  ;;  %v920_v48 = vadd.f32 %v5586_v15, %v834_v35  ;;  %vm964_vm12 = vcmp.eq.s32.totalorder %v3747_v9, %v954_v30  ;;  %vm968_vm13 = vcmp.eq.s32.totalorder %v3764_v49, %v954_v30 }
  0xee   : > { %vm1058_vm14 = vcmp.eq.s32.totalorder %v3747_v9, %v1048_v56  ;;  %vm1062_vm15 = vcmp.eq.s32.totalorder %v3764_v49, %v1048_v56  ;;  %v492_v11 = vrot.slane %v476_v50, %v3776_v61  ;;  %v586_v33 = vrot.slane %v570_v18, %v3776_v61  ;;  %v5594_v56 = vld [vmem:[#allocation38_spill] sm:$0xff] }
  0xef   : > { %v924_v57 = vsel %vm870_vm10, %v916_v32, %v830_v47  ;;  %v928_v28 = vsel %vm874_vm11, %v920_v48, %v834_v35  ;;  %v680_v52 = vrot.slane %v664_v41, %v3776_v61  ;;  %vm410_vm0 = vcmp.eq.s32.totalorder %v3747_v9, %v406_v45  ;;  %v5589_v35 = vld [vmem:[#allocation34_spill] sm:$0xff] }
  0xf0   : > { %v1010_v29 = vadd.f32 %v5587_v42, %v924_v57  ;;  %v1014_v3 = vadd.f32 %v5587_v42, %v928_v28  ;;  %vm414_vm1 = vcmp.eq.s32.totalorder %v3764_v49, %v406_v45  ;;  %v456_v50 = vsel %vm410_vm0, %v5588_v12, 0.0  ;;  %v5590_v32 = vld [vmem:[#allocation26_spill] sm:$0xff] }
  0xf1   : > { %v460_v15 = vsel %vm414_vm1, %v5588_v12, 0.0  ;;  %vm496_vm2 = vcmp.eq.s32.totalorder %v3747_v9, %v492_v11  ;;  %vm500_vm3 = vcmp.eq.s32.totalorder %v3764_v49, %v492_v11  ;;  %v542_v18 = vadd.f32 %v5589_v35, %v456_v50 }
  0xf2   : > { %v1018_v37 = vsel %vm964_vm12, %v1010_v29, %v924_v57  ;;  %v1022_v47 = vsel %vm968_vm13, %v1014_v3, %v928_v28  ;;  %v546_v41 = vadd.f32 %v5589_v35, %v460_v15  ;;  %vm590_vm4 = vcmp.eq.s32.totalorder %v3747_v9, %v586_v33  ;;  %v1578_v3 = vpop.permute.xlu0 %1577 }
  0xf3   : > { %v1104_v48 = vadd.f32 %v5590_v32, %v1018_v37  ;;  %v1108_v45 = vadd.f32 %v5590_v32, %v1022_v47  ;;  %vm594_vm5 = vcmp.eq.s32.totalorder %v3764_v49, %v586_v33  ;;  %v550_v12 = vsel %vm496_vm2, %v542_v18, %v456_v50  ;;  %v5591_v33 = vld [vmem:[#allocation29_spill] sm:$0xff] }
  0xf4   : > { %v554_v11 = vsel %vm500_vm3, %v546_v41, %v460_v15  ;;  %vm684_vm6 = vcmp.eq.s32.totalorder %v3747_v9, %v680_v52  ;;  %vm688_vm7 = vcmp.eq.s32.totalorder %v3764_v49, %v680_v52  ;;  %v636_v28 = vadd.f32 %v4030_v46, %v550_v12  ;;  %v5592_v15 = vld [vmem:[#allocation32_spill] sm:$0xff]  ;;  %v5593_v41 = vld [vmem:[#allocation35_spill] sm:$0xff] }
  0xf5   : > { %v1112_v30 = vsel %vm1058_vm14, %v1104_v48, %v1018_v37  ;;  %v1116_v57 = vsel %vm1062_vm15, %v1108_v45, %v1022_v47  ;;  %v640_v29 = vadd.f32 %v4030_v46, %v554_v11  ;;  %v758_v50 = vrot.slane %v5591_v33, %v3767_v54 }
  0xf6   : > { %v3277_v35 = vpack.c.bf16 %v1116_v57, %v1112_v30  ;;  %v852_v18 = vrot.slane %v5592_v15, %v3767_v54  ;;  %v946_v32 = vrot.slane %v5593_v41, %v3767_v54  ;;  %v644_v42 = vsel %vm590_vm4, %v636_v28, %v550_v12 }
  0xf7   : > { %v648_v37 = vsel %vm594_vm5, %v640_v29, %v554_v11  ;;  %v1040_v47 = vrot.slane %v5594_v56, %v3767_v54  ;;  %vm1579_vm8 = vcmask 130048   ;;  %v730_v48 = vadd.f32 %v4033_v53, %v644_v42 }
  0xf8   : > { %3278 = vmatprep.subr.bf16.mxu0 %v3277_v35  ;;  %v734_v45 = vadd.f32 %v4033_v53, %v648_v37  ;;  %v774_v30 = vrot.slane %v758_v50, %v3776_v61  ;;  %v868_v57 = vrot.slane %v852_v18, %v3776_v61  ;;  %v962_v46 = vrot.slane %v946_v32, %v3776_v61 }
  0xf9   : > { %v1056_v63 = vrot.slane %v1040_v47, %v3776_v61  ;;  %3222 = vmatmul.mubr.msk.f32.vlgmr.msra.gmra.mrb[0].mxu0 %vm1579_vm8, %v1578_v3  ;;  %3223 = vmatmul.mubr.msk.f32.vlgmr.msra.gmra.mrb[0].mxu1 %vm1579_vm8, %v1578_v3  ;;  %v378_v12 = vrot.slane %v3786_v8, %v3776_v61  ;;  %v4522_v35 = vadd.s32 4294967264, %v3786_v8  ;;  %v738_v11 = vsel %vm684_vm6, %v730_v48, %v644_v42 }
  0xfa   : > { %v742_v28 = vsel %vm688_vm7, %v734_v45, %v648_v37  ;;  %vm778_vm9 = vcmp.eq.s32.totalorder %v3747_v9, %v774_v30  ;;  %vm782_vm10 = vcmp.eq.s32.totalorder %v3764_v49, %v774_v30  ;;  %v5595_v32 = vmov 0.0  }
  0xfb   : > { %1790 = vmatprep.mubr.f32.mxu0 %v5595_v32  ;;  %v824_v29 = vadd.f32 %v4048_v51, %v738_v11  ;;  %v828_v3 = vadd.f32 %v4048_v51, %v742_v28  ;;  %vm872_vm11 = vcmp.eq.s32.totalorder %v3747_v9, %v868_v57  ;;  %vm876_vm12 = vcmp.eq.s32.totalorder %v3764_v49, %v868_v57 }
  0xfc   : > { %1861 = vmatprep.mubr.f32.mxu1 %v5595_v32  ;;  %vm966_vm13 = vcmp.eq.s32.totalorder %v3747_v9, %v962_v46  ;;  %vm970_vm14 = vcmp.eq.s32.totalorder %v3764_v49, %v962_v46  ;;  %vm1060_vm15 = vcmp.eq.s32.totalorder %v3747_v9, %v1056_v63  ;;  %vm1064_vm0 = vcmp.eq.s32.totalorder %v3764_v49, %v1056_v63 }
  0xfd   : > { %v832_v52 = vsel %vm778_vm9, %v824_v29, %v738_v11  ;;  %v836_v42 = vsel %vm782_vm10, %v828_v3, %v742_v28  ;;  %v394_v50 = vrot.slane %v378_v12, %v3776_v61  ;;  %v464_v18 = vrot.slane %v3788_v13, %v3776_v61 }
  0xfe   : > { %v918_v37 = vadd.f32 %v4078_v40, %v832_v52  ;;  %v922_v47 = vadd.f32 %v4078_v40, %v836_v42  ;;  %v558_v48 = vrot.slane %v3794_v10, %v3776_v61  ;;  %v652_v45 = vrot.slane %v3798_v21, %v3776_v61 }
  0xff   : > { %vm407_vm1 = vcmp.eq.s32.totalorder %v3747_v9, %v394_v50  ;;  %vm411_vm2 = vcmp.eq.s32.totalorder %v3764_v49, %v394_v50  ;;  %v480_v30 = vrot.slane %v464_v18, %v3776_v61  ;;  %v746_v12 = vrot.slane %v5575_v39, %v3776_v61 }
 0x100   : > { %v926_v11 = vsel %vm872_vm11, %v918_v37, %v832_v52  ;;  %v930_v28 = vsel %vm876_vm12, %v922_v47, %v836_v42  ;;  %v453_v29 = vsel %vm407_vm1, %v4132_v14, 0.0  ;;  %v457_v3 = vsel %vm411_vm2, %v4132_v14, 0.0 }
 0x101   : > { %v1012_v8 = vadd.f32 %v4086_v19, %v926_v11  ;;  %v1016_v40 = vadd.f32 %v4086_v19, %v930_v28  ;;  %vm493_vm3 = vcmp.eq.s32.totalorder %v3747_v9, %v480_v30  ;;  %vm497_vm4 = vcmp.eq.s32.totalorder %v3764_v49, %v480_v30 }
 0x102   : > { %v539_v50 = vadd.f32 %v4151_v58, %v453_v29  ;;  %v543_v18 = vadd.f32 %v4151_v58, %v457_v3  ;;  %v574_v52 = vrot.slane %v558_v48, %v3776_v61  ;;  %v668_v57 = vrot.slane %v652_v45, %v3776_v61 }
 0x103   : > { %v1020_v42 = vsel %vm966_vm13, %v1012_v8, %v926_v11  ;;  %v1024_v37 = vsel %vm970_vm14, %v1016_v40, %v930_v28  ;;  %v762_v47 = vrot.slane %v746_v12, %v3776_v61  ;;  %v840_v19 = vrot.slane %v5577_v59, %v3776_v61 }
 0x104   : > { %v1106_v30 = vadd.f32 %v4102_v16, %v1020_v42  ;;  %v1110_v14 = vadd.f32 %v4102_v16, %v1024_v37  ;;  %v547_v58 = vsel %vm493_vm3, %v539_v50, %v453_v29  ;;  %v551_v51 = vsel %vm497_vm4, %v543_v18, %v457_v3 }
 0x105   : > { %vm587_vm5 = vcmp.eq.s32.totalorder %v3747_v9, %v574_v52  ;;  %vm591_vm6 = vcmp.eq.s32.totalorder %v3764_v49, %v574_v52  ;;  %v633_v8 = vadd.f32 %v4146_v36, %v547_v58  ;;  %v637_v46 = vadd.f32 %v4146_v36, %v551_v51 }
 0x106   : > { %v1114_v40 = vsel %vm1060_vm15, %v1106_v30, %v1020_v42  ;;  %v1118_v48 = vsel %vm1064_vm0, %v1110_v14, %v1024_v37  ;;  %vm681_vm7 = vcmp.eq.s32.totalorder %v3747_v9, %v668_v57  ;;  %vm685_vm9 = vcmp.eq.s32.totalorder %v3764_v49, %v668_v57 }
 0x107   : > { %v3281_v45 = vpack.c.bf16 %v1118_v48, %v1114_v40  ;;  %v641_v12 = vsel %vm587_vm5, %v633_v8, %v547_v58  ;;  %v645_v11 = vsel %vm591_vm6, %v637_v46, %v551_v51  ;;  %vm775_vm10 = vcmp.eq.s32.totalorder %v3747_v9, %v762_v47 }
 0x108   : > { %v727_v28 = vadd.f32 %v4164_v0, %v641_v12  ;;  %v731_v29 = vadd.f32 %v4164_v0, %v645_v11  ;;  %vm779_vm11 = vcmp.eq.s32.totalorder %v3764_v49, %v762_v47  ;;  %v856_v3 = vrot.slane %v840_v19, %v3776_v61 }
 0x109   : > { %3282 = vmatprep.subr.bf16.mxu1 %v3281_v45  ;;  %v934_v14 = vrot.slane %v5579_v6, %v3776_v61  ;;  %v1028_v63 = vrot.slane %v5580_v20, %v3776_v61  ;;  %v386_v51 = vrot.slane %v5582_v43, %v3776_v61  ;;  %v472_v58 = vrot.slane %v5583_v38, %v3776_v61 }
 0x10a   : > { %v735_v50 = vsel %vm681_vm7, %v727_v28, %v641_v12  ;;  %v739_v18 = vsel %vm685_vm9, %v731_v29, %v645_v11  ;;  %vm869_vm12 = vcmp.eq.s32.totalorder %v3747_v9, %v856_v3  ;;  %vm873_vm13 = vcmp.eq.s32.totalorder %v3764_v49, %v856_v3 }
 0x10b   : > { %v821_v19 = vadd.f32 %v4175_v22, %v735_v50  ;;  %v825_v52 = vadd.f32 %v4175_v22, %v739_v18  ;;  %v950_v57 = vrot.slane %v934_v14, %v3776_v61  ;;  %v1044_v42 = vrot.slane %v1028_v63, %v3776_v61 }
 0x10c   : > { %v402_v37 = vrot.slane %v386_v51, %v3776_v61  ;;  %v488_v30 = vrot.slane %v472_v58, %v3776_v61  ;;  %v566_v8 = vrot.slane %v5584_v23, %v3776_v61  ;;  %v660_v46 = vrot.slane %v5585_v4, %v3776_v61 }
 0x10d   : > { %v829_v40 = vsel %vm775_vm10, %v821_v19, %v735_v50  ;;  %v833_v48 = vsel %vm779_vm11, %v825_v52, %v739_v18  ;;  %vm963_vm14 = vcmp.eq.s32.totalorder %v3747_v9, %v950_v57  ;;  %vm967_vm15 = vcmp.eq.s32.totalorder %v3764_v49, %v950_v57 }
 0x10e   : > { %v915_v45 = vadd.f32 %v4178_v24, %v829_v40  ;;  %v919_v12 = vadd.f32 %v4178_v24, %v833_v48  ;;  %vm1057_vm0 = vcmp.eq.s32.totalorder %v3747_v9, %v1044_v42  ;;  %vm1061_vm1 = vcmp.eq.s32.totalorder %v3764_v49, %v1044_v42 }
 0x10f   : > { %vm409_vm2 = vcmp.eq.s32.totalorder %v3747_v9, %v402_v37  ;;  %vm413_vm3 = vcmp.eq.s32.totalorder %v3764_v49, %v402_v37  ;;  %vm495_vm4 = vcmp.eq.s32.totalorder %v3747_v9, %v488_v30  ;;  %vm499_vm5 = vcmp.eq.s32.totalorder %v3764_v49, %v488_v30 }
 0x110   : > { %v923_v47 = vsel %vm869_vm12, %v915_v45, %v829_v40  ;;  %v927_v11 = vsel %vm873_vm13, %v919_v12, %v833_v48  ;;  %v455_v28 = vsel %vm409_vm2, %v4269_v17, 0.0  ;;  %v459_v29 = vsel %vm413_vm3, %v4269_v17, 0.0 }
 0x111   : > { %v1009_v14 = vadd.f32 %v4181_v25, %v923_v47  ;;  %v1013_v63 = vadd.f32 %v4181_v25, %v927_v11  ;;  %v541_v51 = vadd.f32 %v4272_v60, %v455_v28  ;;  %v545_v58 = vadd.f32 %v4272_v60, %v459_v29 }
 0x112   : > { %v582_v50 = vrot.slane %v566_v8, %v3776_v61  ;;  %v676_v18 = vrot.slane %v660_v46, %v3776_v61  ;;  %v754_v3 = vrot.slane %v5591_v33, %v3776_v61  ;;  %v848_v19 = vrot.slane %v5592_v15, %v3776_v61 }
 0x113   : > { %v1017_v52 = vsel %vm963_vm14, %v1009_v14, %v923_v47  ;;  %v1021_v37 = vsel %vm967_vm15, %v1013_v63, %v927_v11  ;;  %v549_v40 = vsel %vm495_vm4, %v541_v51, %v455_v28  ;;  %v553_v8 = vsel %vm499_vm5, %v545_v58, %v459_v29 }
 0x114   : > { %v1103_v46 = vadd.f32 %v4184_v26, %v1017_v52  ;;  %v1107_v48 = vadd.f32 %v4184_v26, %v1021_v37  ;;  %vm589_vm6 = vcmp.eq.s32.totalorder %v3747_v9, %v582_v50  ;;  %vm593_vm7 = vcmp.eq.s32.totalorder %v3764_v49, %v582_v50 }
 0x115   : > { %v635_v45 = vadd.f32 %v4278_v2, %v549_v40  ;;  %v639_v12 = vadd.f32 %v4278_v2, %v553_v8  ;;  %vm683_vm9 = vcmp.eq.s32.totalorder %v3747_v9, %v676_v18  ;;  %vm687_vm10 = vcmp.eq.s32.totalorder %v3764_v49, %v676_v18 }
 0x116   : > { %v1111_v57 = vsel %vm1057_vm0, %v1103_v46, %v1017_v52  ;;  %v1115_v30 = vsel %vm1061_vm1, %v1107_v48, %v1021_v37  ;;  %v770_v47 = vrot.slane %v754_v3, %v3776_v61  ;;  %v864_v11 = vrot.slane %v848_v19, %v3776_v61 }
 0x117   : > { %v3279_v28 = vpack.c.bf16 %v1115_v30, %v1111_v57  ;;  %v643_v29 = vsel %vm589_vm6, %v635_v45, %v549_v40  ;;  %v647_v14 = vsel %vm593_vm7, %v639_v12, %v553_v8  ;;  %v942_v63 = vrot.slane %v5593_v41, %v3776_v61  ;;  %v4695_v12 = vld [vmem:[#allocation7] sm:$0xff] }
 0x118   : > { %v729_v51 = vadd.f32 %v4293_v62, %v643_v29  ;;  %v733_v58 = vadd.f32 %v4293_v62, %v647_v14  ;;  %vm777_vm11 = vcmp.eq.s32.totalorder %v3747_v9, %v770_v47  ;;  %vm781_vm12 = vcmp.eq.s32.totalorder %v3764_v49, %v770_v47 }
 0x119   : > { %3280 = vmatpush1.bf16.msra.mxu0 %v3279_v28  ;;  %vm871_vm13 = vcmp.eq.s32.totalorder %v3747_v9, %v864_v11  ;;  %vm875_vm14 = vcmp.eq.s32.totalorder %v3764_v49, %v864_v11  ;;  %v958_v42 = vrot.slane %v942_v63, %v3776_v61  ;;  %v1036_v50 = vrot.slane %v5594_v56, %v3776_v61 }
 0x11a   : > { %v737_v3 = vsel %vm683_vm9, %v729_v51, %v643_v29  ;;  %v741_v19 = vsel %vm687_vm10, %v733_v58, %v647_v14  ;;  %v1877_v52 = vrot.slane %v4522_v35, %v3767_v54  ;;  %v4682_v37 = vadd.s32 4294967264, %v3788_v13 }
 0x11b   : > { %v823_v40 = vadd.f32 %v4296_v44, %v737_v3  ;;  %v827_v8 = vadd.f32 %v4296_v44, %v741_v19  ;;  %vm965_vm15 = vcmp.eq.s32.totalorder %v3747_v9, %v958_v42  ;;  %vm969_vm0 = vcmp.eq.s32.totalorder %v3764_v49, %v958_v42 }
 0x11c   : > { %v1052_v46 = vrot.slane %v1036_v50, %v3776_v61  ;;  %v1893_v48 = vrot.slane %v1877_v52, %v3776_v61  ;;  %v1927_v18 = vrot.slane %v4682_v37, %v3767_v54  ;;  %v4693_v45 = vadd.s32 4294967264, %v3794_v10  ;;  %3224 = vmatmul.mubr.msk.f32.vlgmr.msra.gmra.mrb[0].mxu0 %vm1579_vm8, %v4695_v12 }
 0x11d   : > { %v831_v57 = vsel %vm777_vm11, %v823_v40, %v737_v3  ;;  %v835_v30 = vsel %vm781_vm12, %v827_v8, %v741_v19  ;;  %v4704_v28 = vadd.s32 4294967264, %v3798_v21  ;;  %v4707_v29 = vadd.s32 4294967264, %v5575_v39  ;;  %2392 = vmatprep.mubr.f32.mxu0 %v5595_v32 }
 0x11e   : > { %v917_v14 = vadd.f32 %v4313_v5, %v831_v57  ;;  %v921_v63 = vadd.f32 %v4313_v5, %v835_v30  ;;  %vm1059_vm1 = vcmp.eq.s32.totalorder %v3747_v9, %v1052_v46  ;;  %vm1063_vm2 = vcmp.eq.s32.totalorder %v3764_v49, %v1052_v46 }
 0x11f   : > { %vm1903_vm3 = vcmp.eq.s32.totalorder %v3747_v9, %v1893_v48  ;;  %vm1907_vm4 = vcmp.eq.s32.totalorder %v3764_v49, %v1893_v48  ;;  %v1943_v47 = vrot.slane %v1927_v18, %v3776_v61  ;;  %v1985_v51 = vrot.slane %v4693_v45, %v3767_v54 }
 0x120   : > { %v925_v58 = vsel %vm871_vm13, %v917_v14, %v831_v57  ;;  %v929_v50 = vsel %vm875_vm14, %v921_v63, %v835_v30  ;;  %v1911_v3 = vsel %vm1903_vm3, %v3813_v27, 0.0  ;;  %v1915_v19 = vsel %vm1907_vm4, %v3813_v27, 0.0 }
 0x121   : > { %v1011_v52 = vadd.f32 %v4316_v1, %v925_v58  ;;  %v1015_v40 = vadd.f32 %v4316_v1, %v929_v50  ;;  %vm1953_vm5 = vcmp.eq.s32.totalorder %v3747_v9, %v1943_v47  ;;  %vm1957_vm6 = vcmp.eq.s32.totalorder %v3764_v49, %v1943_v47 }
 0x122   : > { %v1961_v8 = vadd.f32 %v1911_v3, %v5574_v34  ;;  %v1965_v48 = vadd.f32 %v1915_v19, %v5574_v34  ;;  %v2001_v18 = vrot.slane %v1985_v51, %v3776_v61  ;;  %v2043_v11 = vrot.slane %v4704_v28, %v3767_v54 }
 0x123   : > { %v1019_v57 = vsel %vm965_vm15, %v1011_v52, %v925_v58  ;;  %v1023_v30 = vsel %vm969_vm0, %v1015_v40, %v929_v50  ;;  %v2101_v14 = vrot.slane %v4707_v29, %v3767_v54  ;;  %v4741_v63 = vadd.s32 4294967264, %v5577_v59 }
 0x124   : > { %v1105_v47 = vadd.f32 %v4319_v7, %v1019_v57  ;;  %v1109_v34 = vadd.f32 %v4319_v7, %v1023_v30  ;;  %v1969_v51 = vsel %vm1953_vm5, %v1961_v8, %v1911_v3  ;;  %v1973_v27 = vsel %vm1957_vm6, %v1965_v48, %v1915_v19 }
 0x125   : > { %vm2011_vm7 = vcmp.eq.s32.totalorder %v3747_v9, %v2001_v18  ;;  %vm2015_vm9 = vcmp.eq.s32.totalorder %v3764_v49, %v2001_v18  ;;  %v2019_v58 = vadd.f32 %v1969_v51, %v5576_v31  ;;  %v2023_v42 = vadd.f32 %v1973_v27, %v5576_v31 }
 0x126   : > { %v1113_v50 = vsel %vm1059_vm1, %v1105_v47, %v1019_v57  ;;  %v1117_v52 = vsel %vm1063_vm2, %v1109_v34, %v1023_v30  ;;  %v2059_v40 = vrot.slane %v2043_v11, %v3776_v61  ;;  %v2117_v7 = vrot.slane %v2101_v14, %v3776_v61  ;;  %v5596_v47 = vld [vmem:[#allocation23_spill] sm:$0xff] }
 0x127   : > { %v3283_v3 = vpack.c.bf16 %v1117_v52, %v1113_v50  ;;  %v2027_v19 = vsel %vm2011_vm7, %v2019_v58, %v1969_v51  ;;  %v2031_v8 = vsel %vm2015_vm9, %v2023_v42, %v1973_v27  ;;  %v2159_v48 = vrot.slane %v4741_v63, %v3767_v54 }
 0x128   : > { %vm2069_vm10 = vcmp.eq.s32.totalorder %v3747_v9, %v2059_v40  ;;  %vm2073_vm11 = vcmp.eq.s32.totalorder %v3764_v49, %v2059_v40  ;;  %v2077_v18 = vadd.f32 %v2027_v19, %v5578_v55  ;;  %v2081_v57 = vadd.f32 %v2031_v8, %v5578_v55 }
 0x129   : > { %3284 = vmatpush1.bf16.msra.mxu1 %v3283_v3  ;;  %vm2127_vm12 = vcmp.eq.s32.totalorder %v3747_v9, %v2117_v7  ;;  %vm2131_vm13 = vcmp.eq.s32.totalorder %v3764_v49, %v2117_v7  ;;  %v2175_v34 = vrot.slane %v2159_v48, %v3776_v61  ;;  %v4765_v27 = vadd.s32 4294967264, %v5579_v6 }
 0x12a   : > { %v2085_v46 = vsel %vm2069_vm10, %v2077_v18, %v2027_v19  ;;  %v2089_v11 = vsel %vm2073_vm11, %v2081_v57, %v2031_v8  ;;  %v4768_v30 = vadd.s32 4294967264, %v5580_v20  ;;  %v4771_v14 = vadd.s32 4294967264, %v5582_v43  ;;  %v5597_v18 = vld [vmem:[#allocation24_spill] sm:$0xff]  ;;  %v5601_v20 = vld [vmem:[#allocation34_spill] sm:$0xff] }
 0x12b   : > { %v2135_v51 = vadd.f32 %v2085_v46, %v5596_v47  ;;  %v2139_v58 = vadd.f32 %v2089_v11, %v5596_v47  ;;  %vm2185_vm14 = vcmp.eq.s32.totalorder %v3747_v9, %v2175_v34  ;;  %vm2189_vm15 = vcmp.eq.s32.totalorder %v3764_v49, %v2175_v34 }
 0x12c   : > { %v2217_v42 = vrot.slane %v4765_v27, %v3767_v54  ;;  %v2275_v50 = vrot.slane %v4768_v30, %v3767_v54  ;;  %v1885_v52 = vrot.slane %v4771_v14, %v3767_v54  ;;  %v4784_v40 = vadd.s32 4294967264, %v5583_v38  ;;  %3225 = vmatmul.mubr.msk.f32.vlgmr.msra.gmra.mrb[0].mxu1 %vm1579_vm8, %v4695_v12 }
 0x12d   : > { %v2143_v3 = vsel %vm2127_vm12, %v2135_v51, %v2085_v46  ;;  %v2147_v19 = vsel %vm2131_vm13, %v2139_v58, %v2089_v11  ;;  %v4793_v8 = vadd.s32 4294967264, %v5584_v23  ;;  %v4796_v48 = vadd.s32 4294967264, %v5585_v4  ;;  %2463 = vmatprep.mubr.f32.mxu1 %v5595_v32  ;;  %v5600_v23 = vld [vmem:[#allocation26_spill] sm:$0xff] }
 0x12e   : > { %v2193_v57 = vadd.f32 %v2143_v3, %v5597_v18  ;;  %v2197_v38 = vadd.f32 %v2147_v19, %v5597_v18  ;;  %v2233_v12 = vrot.slane %v2217_v42, %v3776_v61  ;;  %v2291_v47 = vrot.slane %v2275_v50, %v3776_v61  ;;  %v5598_v42 = vld [vmem:[#allocation25_spill] sm:$0xff] }
 0x12f   : > { %v1901_v46 = vrot.slane %v1885_v52, %v3776_v61  ;;  %v1935_v7 = vrot.slane %v4784_v40, %v3767_v54  ;;  %v1993_v11 = vrot.slane %v4793_v8, %v3767_v54  ;;  %v2051_v51 = vrot.slane %v4796_v48, %v3767_v54 }
 0x130   : > { %v2201_v58 = vsel %vm2185_vm14, %v2193_v57, %v2143_v3  ;;  %v2205_v18 = vsel %vm2189_vm15, %v2197_v38, %v2147_v19  ;;  %vm2243_vm0 = vcmp.eq.s32.totalorder %v3747_v9, %v2233_v12  ;;  %vm2247_vm1 = vcmp.eq.s32.totalorder %v3764_v49, %v2233_v12  ;;  %v5599_v57 = vld [vmem:[#allocation33_spill] sm:$0xff] }
 0x131   : > { %v2251_v50 = vadd.f32 %v2201_v58, %v5598_v42  ;;  %v2255_v52 = vadd.f32 %v2205_v18, %v5598_v42  ;;  %vm2301_vm2 = vcmp.eq.s32.totalorder %v3747_v9, %v2291_v47  ;;  %vm2305_vm3 = vcmp.eq.s32.totalorder %v3764_v49, %v2291_v47 }
 0x132   : > { %vm1905_vm4 = vcmp.eq.s32.totalorder %v3747_v9, %v1901_v46  ;;  %vm1909_vm5 = vcmp.eq.s32.totalorder %v3764_v49, %v1901_v46  ;;  %v1951_v3 = vrot.slane %v1935_v7, %v3776_v61  ;;  %v2009_v38 = vrot.slane %v1993_v11, %v3776_v61 }
 0x133   : > { %v2259_v34 = vsel %vm2243_vm0, %v2251_v50, %v2201_v58  ;;  %v2263_v19 = vsel %vm2247_vm1, %v2255_v52, %v2205_v18  ;;  %v1913_v12 = vsel %vm1905_vm4, %v5599_v57, 0.0  ;;  %v1917_v4 = vsel %vm1909_vm5, %v5599_v57, 0.0  ;;  %v5602_v57 = vld [vmem:[#allocation36_spill] sm:$0xff] }
 0x134   : > { %v2309_v42 = vadd.f32 %v2259_v34, %v5600_v23  ;;  %v2313_v43 = vadd.f32 %v2263_v19, %v5600_v23  ;;  %vm1955_vm6 = vcmp.eq.s32.totalorder %v3747_v9, %v1951_v3  ;;  %vm1959_vm7 = vcmp.eq.s32.totalorder %v3764_v49, %v1951_v3 }
 0x135   : > { %v1963_v46 = vadd.f32 %v1913_v12, %v5601_v20  ;;  %v1967_v7 = vadd.f32 %v1917_v4, %v5601_v20  ;;  %vm2013_vm9 = vcmp.eq.s32.totalorder %v3747_v9, %v2009_v38  ;;  %vm2017_vm10 = vcmp.eq.s32.totalorder %v3764_v49, %v2009_v38 }
 0x136   : > { %v2317_v18 = vsel %vm2301_vm2, %v2309_v42, %v2259_v34  ;;  %v2321_v11 = vsel %vm2305_vm3, %v2313_v43, %v2263_v19  ;;  %v2067_v58 = vrot.slane %v2051_v51, %v3776_v61  ;;  %v4840_v50 = vadd.s32 4294967264, %v5591_v33 }
 0x137   : > { %v3285_v52 = vpack.c.bf16 %v2321_v11, %v2317_v18  ;;  %v1971_v3 = vsel %vm1955_vm6, %v1963_v46, %v1913_v12  ;;  %v1975_v23 = vsel %vm1959_vm7, %v1967_v7, %v1917_v4  ;;  %v4843_v20 = vadd.s32 4294967264, %v5592_v15 }
 0x138   : > { %v2021_v55 = vadd.f32 %v1971_v3, %v5602_v57  ;;  %v2025_v6 = vadd.f32 %v1975_v23, %v5602_v57  ;;  %vm2071_vm11 = vcmp.eq.s32.totalorder %v3747_v9, %v2067_v58  ;;  %vm2075_vm12 = vcmp.eq.s32.totalorder %v3764_v49, %v2067_v58 }
 0x139   : > { %3286 = vmatprep.subr.bf16.mxu0 %v3285_v52  ;;  %v2109_v43 = vrot.slane %v4840_v50, %v3767_v54  ;;  %v2167_v47 = vrot.slane %v4843_v20, %v3767_v54  ;;  %v4854_v4 = vadd.s32 4294967264, %v5593_v41  ;;  %v4857_v51 = vadd.s32 4294967264, %v5594_v56  ;;  %v5603_v52 = vld [vmem:[#allocation39_spill] sm:$0xff] }
 0x13a   : > { %v2029_v42 = vsel %vm2013_vm9, %v2021_v55, %v1971_v3  ;;  %v2033_v34 = vsel %vm2017_vm10, %v2025_v6, %v1975_v23  ;;  %v1873_v19 = vrot.slane %v4522_v35, %v3776_v61  ;;  %v1923_v12 = vrot.slane %v4682_v37, %v3776_v61 }
 0x13b   : > { %v2079_v46 = vadd.f32 %v2029_v42, %v4033_v53  ;;  %v2083_v7 = vadd.f32 %v2033_v34, %v4033_v53  ;;  %v2125_v18 = vrot.slane %v2109_v43, %v3776_v61  ;;  %v2183_v11 = vrot.slane %v2167_v47, %v3776_v61 }
 0x13c   : > { %v2225_v55 = vrot.slane %v4854_v4, %v3767_v54  ;;  %v2283_v6 = vrot.slane %v4857_v51, %v3767_v54  ;;  %v1889_v23 = vrot.slane %v1873_v19, %v3776_v61  ;;  %v1939_v35 = vrot.slane %v1923_v12, %v3776_v61 }
 0x13d   : > { %v2087_v37 = vsel %vm2071_vm11, %v2079_v46, %v2029_v42  ;;  %v2091_v38 = vsel %vm2075_vm12, %v2083_v7, %v2033_v34  ;;  %vm2129_vm13 = vcmp.eq.s32.totalorder %v3747_v9, %v2125_v18  ;;  %vm2133_vm14 = vcmp.eq.s32.totalorder %v3764_v49, %v2125_v18  ;;  %v5604_v34 = vld [vmem:[#allocation42_spill] sm:$0xff]  ;;  %v5605_v7 = vld [vmem:[#allocation40_spill] sm:$0xff] }
 0x13e   : > { %v2137_v3 = vadd.f32 %v2087_v37, %v5603_v52  ;;  %v2141_v43 = vadd.f32 %v2091_v38, %v5603_v52  ;;  %vm2187_vm15 = vcmp.eq.s32.totalorder %v3747_v9, %v2183_v11  ;;  %vm2191_vm0 = vcmp.eq.s32.totalorder %v3764_v49, %v2183_v11 }
 0x13f   : > { %v2241_v47 = vrot.slane %v2225_v55, %v3776_v61  ;;  %v2299_v19 = vrot.slane %v2283_v6, %v3776_v61  ;;  %vm1902_vm1 = vcmp.eq.s32.totalorder %v3747_v9, %v1889_v23  ;;  %vm1906_vm2 = vcmp.eq.s32.totalorder %v3764_v49, %v1889_v23  ;;  %v5606_v23 = vld [vmem:[#allocation43_spill] sm:$0xff] }
 0x140   : > { %v2145_v58 = vsel %vm2129_vm13, %v2137_v3, %v2087_v37  ;;  %v2149_v42 = vsel %vm2133_vm14, %v2141_v43, %v2091_v38  ;;  %v1910_v12 = vsel %vm1902_vm1, %v5604_v34, 0.0  ;;  %v1914_v46 = vsel %vm1906_vm2, %v5604_v34, 0.0  ;;  %v5607_v3 = vld [vmem:[#allocation41_spill] sm:$0xff] }
 0x141   : > { %v2195_v18 = vadd.f32 %v2145_v58, %v5605_v7  ;;  %v2199_v52 = vadd.f32 %v2149_v42, %v5605_v7  ;;  %vm2245_vm3 = vcmp.eq.s32.totalorder %v3747_v9, %v2241_v47  ;;  %vm2249_vm4 = vcmp.eq.s32.totalorder %v3764_v49, %v2241_v47 }
 0x142   : > { %vm2303_vm5 = vcmp.eq.s32.totalorder %v3747_v9, %v2299_v19  ;;  %vm2307_vm6 = vcmp.eq.s32.totalorder %v3764_v49, %v2299_v19  ;;  %vm1952_vm7 = vcmp.eq.s32.totalorder %v3747_v9, %v1939_v35  ;;  %vm1956_vm9 = vcmp.eq.s32.totalorder %v3764_v49, %v1939_v35 }
 0x143   : > { %v2203_v55 = vsel %vm2187_vm15, %v2195_v18, %v2145_v58  ;;  %v2207_v6 = vsel %vm2191_vm0, %v2199_v52, %v2149_v42  ;;  %v1960_v37 = vadd.f32 %v1910_v12, %v5606_v23  ;;  %v1964_v38 = vadd.f32 %v1914_v46, %v5606_v23 }
 0x144   : > { %v2253_v43 = vadd.f32 %v2203_v55, %v5607_v3  ;;  %v2257_v7 = vadd.f32 %v2207_v6, %v5607_v3  ;;  %v1981_v34 = vrot.slane %v4693_v45, %v3776_v61  ;;  %v2039_v35 = vrot.slane %v4704_v28, %v3776_v61 }
 0x145   : > { %v1968_v53 = vsel %vm1952_vm7, %v1960_v37, %v1910_v12  ;;  %v1972_v56 = vsel %vm1956_vm9, %v1964_v38, %v1914_v46  ;;  %v2097_v11 = vrot.slane %v4707_v29, %v3776_v61  ;;  %v2155_v52 = vrot.slane %v4741_v63, %v3776_v61 }
 0x146   : > { %v2261_v58 = vsel %vm2245_vm3, %v2253_v43, %v2203_v55  ;;  %v2265_v42 = vsel %vm2249_vm4, %v2257_v7, %v2207_v6  ;;  %v1997_v18 = vrot.slane %v1981_v34, %v3776_v61  ;;  %v2018_v45 = vadd.f32 %v1968_v53, %v4146_v36 }
 0x147   : > { %v2311_v28 = vadd.f32 %v2261_v58, %v4102_v16  ;;  %v2315_v12 = vadd.f32 %v2265_v42, %v4102_v16  ;;  %v2022_v46 = vadd.f32 %v1972_v56, %v4146_v36  ;;  %v2055_v29 = vrot.slane %v2039_v35, %v3776_v61 }
 0x148   : > { %vm2010_vm10 = vcmp.eq.s32.totalorder %v3747_v9, %v1997_v18  ;;  %vm2014_vm11 = vcmp.eq.s32.totalorder %v3764_v49, %v1997_v18  ;;  %v2113_v63 = vrot.slane %v2097_v11, %v3776_v61  ;;  %v2171_v47 = vrot.slane %v2155_v52, %v3776_v61 }
 0x149   : > { %v2319_v34 = vsel %vm2303_vm5, %v2311_v28, %v2261_v58  ;;  %v2323_v7 = vsel %vm2307_vm6, %v2315_v12, %v2265_v42  ;;  %v2026_v55 = vsel %vm2010_vm10, %v2018_v45, %v1968_v53  ;;  %v2030_v6 = vsel %vm2014_vm11, %v2022_v46, %v1972_v56 }
 0x14a   : > { %v3289_v37 = vpack.c.bf16 %v2323_v7, %v2319_v34  ;;  %vm2068_vm12 = vcmp.eq.s32.totalorder %v3747_v9, %v2055_v29  ;;  %vm2072_vm13 = vcmp.eq.s32.totalorder %v3764_v49, %v2055_v29  ;;  %v2076_v38 = vadd.f32 %v2026_v55, %v4164_v0 }
 0x14b   : > { %v2080_v43 = vadd.f32 %v2030_v6, %v4164_v0  ;;  %vm2126_vm14 = vcmp.eq.s32.totalorder %v3747_v9, %v2113_v63  ;;  %vm2130_vm15 = vcmp.eq.s32.totalorder %v3764_v49, %v2113_v63  ;;  %vm2184_vm0 = vcmp.eq.s32.totalorder %v3747_v9, %v2171_v47 }
 0x14c   : > { %3290 = vmatprep.subr.bf16.mxu1 %v3289_v37  ;;  %v2084_v19 = vsel %vm2068_vm12, %v2076_v38, %v2026_v55  ;;  %vm2188_vm1 = vcmp.eq.s32.totalorder %v3764_v49, %v2171_v47  ;;  %v2213_v53 = vrot.slane %v4765_v27, %v3776_v61  ;;  %v2271_v56 = vrot.slane %v4768_v30, %v3776_v61 }
 0x14d   : > { %v2088_v35 = vsel %vm2072_vm13, %v2080_v43, %v2030_v6  ;;  %v2134_v11 = vadd.f32 %v2084_v19, %v4175_v22  ;;  %v1881_v52 = vrot.slane %v4771_v14, %v3776_v61  ;;  %v1931_v58 = vrot.slane %v4784_v40, %v3776_v61 }
 0x14e   : > { %v2138_v42 = vadd.f32 %v2088_v35, %v4175_v22  ;;  %v2229_v18 = vrot.slane %v2213_v53, %v3776_v61  ;;  %v2287_v45 = vrot.slane %v2271_v56, %v3776_v61  ;;  %v1989_v27 = vrot.slane %v4793_v8, %v3776_v61 }
 0x14f   : > { %v2142_v30 = vsel %vm2126_vm14, %v2134_v11, %v2084_v19  ;;  %v1897_v28 = vrot.slane %v1881_v52, %v3776_v61  ;;  %v1947_v12 = vrot.slane %v1931_v58, %v3776_v61  ;;  %v2047_v14 = vrot.slane %v4796_v48, %v3776_v61 }
 0x150   : > { %v2146_v40 = vsel %vm2130_vm15, %v2138_v42, %v2088_v35  ;;  %v2192_v46 = vadd.f32 %v2142_v30, %v4178_v24  ;;  %vm2242_vm2 = vcmp.eq.s32.totalorder %v3747_v9, %v2229_v18  ;;  %vm2246_vm3 = vcmp.eq.s32.totalorder %v3764_v49, %v2229_v18 }
 0x151   : > { %v2196_v8 = vadd.f32 %v2146_v40, %v4178_v24  ;;  %vm2300_vm4 = vcmp.eq.s32.totalorder %v3747_v9, %v2287_v45  ;;  %vm2304_vm5 = vcmp.eq.s32.totalorder %v3764_v49, %v2287_v45  ;;  %vm1904_vm6 = vcmp.eq.s32.totalorder %v3747_v9, %v1897_v28 }
 0x152   : > { %v2200_v48 = vsel %vm2184_vm0, %v2192_v46, %v2142_v30  ;;  %vm1908_vm7 = vcmp.eq.s32.totalorder %v3764_v49, %v1897_v28  ;;  %v1912_v29 = vsel %vm1904_vm6, %v4269_v17, 0.0  ;;  %vm1954_vm9 = vcmp.eq.s32.totalorder %v3747_v9, %v1947_v12 }
 0x153   : > { %v2204_v63 = vsel %vm2188_vm1, %v2196_v8, %v2146_v40  ;;  %v2250_v34 = vadd.f32 %v2200_v48, %v4181_v25  ;;  %v1916_v7 = vsel %vm1908_vm7, %v4269_v17, 0.0  ;;  %vm1958_vm10 = vcmp.eq.s32.totalorder %v3764_v49, %v1947_v12 }
 0x154   : > { %v2254_v55 = vadd.f32 %v2204_v63, %v4181_v25  ;;  %v1962_v6 = vadd.f32 %v1912_v29, %v4272_v60  ;;  %v1966_v37 = vadd.f32 %v1916_v7, %v4272_v60  ;;  %v2005_v38 = vrot.slane %v1989_v27, %v3776_v61 }
 0x155   : > { %v2258_v43 = vsel %vm2242_vm2, %v2250_v34, %v2200_v48  ;;  %v2063_v47 = vrot.slane %v2047_v14, %v3776_v61  ;;  %v2105_v19 = vrot.slane %v4840_v50, %v3776_v61  ;;  %v2163_v53 = vrot.slane %v4843_v20, %v3776_v61 }
 0x156   : > { %v2262_v56 = vsel %vm2246_vm3, %v2254_v55, %v2204_v63  ;;  %v2308_v35 = vadd.f32 %v2258_v43, %v4184_v26  ;;  %v1970_v11 = vsel %vm1954_vm9, %v1962_v6, %v1912_v29  ;;  %v1974_v52 = vsel %vm1958_vm10, %v1966_v37, %v1916_v7  ;;  %v5020_v63 = vpop.permute.xlu0 %2324  ;;  %v5608_v7 = vld [vmem:[#allocation14_spill] sm:$0xff] }
 0x157   : > { %v2312_v58 = vadd.f32 %v2262_v56, %v4184_v26  ;;  %vm2012_vm11 = vcmp.eq.s32.totalorder %v3747_v9, %v2005_v38  ;;  %vm2016_vm12 = vcmp.eq.s32.totalorder %v3764_v49, %v2005_v38  ;;  %v2020_v42 = vadd.f32 %v1970_v11, %v4278_v2 }
 0x158   : > { %v2316_v50 = vsel %vm2300_vm4, %v2308_v35, %v2258_v43  ;;  %v2024_v20 = vadd.f32 %v1974_v52, %v4278_v2  ;;  %vm2070_vm13 = vcmp.eq.s32.totalorder %v3747_v9, %v2063_v47  ;;  %vm2074_vm14 = vcmp.eq.s32.totalorder %v3764_v49, %v2063_v47 }
 0x159   : > { %v2320_v18 = vsel %vm2304_vm5, %v2312_v58, %v2262_v56  ;;  %v2028_v27 = vsel %vm2012_vm11, %v2020_v42, %v1970_v11  ;;  %v2121_v30 = vrot.slane %v2105_v19, %v3776_v61  ;;  %v2179_v28 = vrot.slane %v2163_v53, %v3776_v61 }
 0x15a   : > { %v3287_v12 = vpack.c.bf16 %v2320_v18, %v2316_v50  ;;  %v2032_v14 = vsel %vm2016_vm12, %v2024_v20, %v1974_v52  ;;  %v2078_v40 = vadd.f32 %v2028_v27, %v4293_v62  ;;  %v2221_v46 = vrot.slane %v4854_v4, %v3776_v61 }
 0x15b   : > { %v2082_v8 = vadd.f32 %v2032_v14, %v4293_v62  ;;  %vm2128_vm15 = vcmp.eq.s32.totalorder %v3747_v9, %v2121_v30  ;;  %vm2132_vm0 = vcmp.eq.s32.totalorder %v3764_v49, %v2121_v30  ;;  %vm2186_vm1 = vcmp.eq.s32.totalorder %v3747_v9, %v2179_v28  ;;  %v5609_v30 = vld [vmem:[#allocation17_spill] sm:$0xff] }
 0x15c   : > { %3288 = vmatpush1.bf16.msra.mxu0 %v3287_v12  ;;  %v2086_v45 = vsel %vm2070_vm13, %v2078_v40, %v2028_v27  ;;  %vm2190_vm2 = vcmp.eq.s32.totalorder %v3764_v49, %v2179_v28  ;;  %v2237_v48 = vrot.slane %v2221_v46, %v3776_v61  ;;  %v2279_v29 = vrot.slane %v4857_v51, %v3776_v61  ;;  %v5611_v46 = vld [vmem:[#allocation44_spill] sm:$0xff] }
 0x15d   : > { %v2090_v4 = vsel %vm2074_vm14, %v2082_v8, %v2032_v14  ;;  %v2136_v34 = vadd.f32 %v2086_v45, %v4296_v44  ;;  %v5026_v55 = vadd.s32 4294967248, %v5608_v7  ;;  %v5029_v6 = vadd.s32 4294967248, %v3788_v13 }
 0x15e   : > { %v2140_v37 = vadd.f32 %v2090_v4, %v4296_v44  ;;  %vm2244_vm3 = vcmp.eq.s32.totalorder %v3747_v9, %v2237_v48  ;;  %vm2248_vm4 = vcmp.eq.s32.totalorder %v3764_v49, %v2237_v48  ;;  %v2295_v51 = vrot.slane %v2279_v29, %v3776_v61 }
 0x15f   : > { %v2144_v38 = vsel %vm2128_vm15, %v2136_v34, %v2086_v45  ;;  %v2483_v43 = vrot.slane %v5026_v55, %v3767_v54  ;;  %v2533_v47 = vrot.slane %v5029_v6, %v3767_v54  ;;  %v5042_v13 = vadd.s32 4294967248, %v3794_v10  ;;  %3242 = vmatmul.mubr.msk.f32.vlgmr.msra.gmra.mrb[0].mxu0 %vm1579_vm8, %v5020_v63 }
 0x160   : > { %v2148_v19 = vsel %vm2132_vm0, %v2140_v37, %v2090_v4  ;;  %v2194_v53 = vadd.f32 %v2144_v38, %v4313_v5  ;;  %vm2302_vm5 = vcmp.eq.s32.totalorder %v3747_v9, %v2295_v51  ;;  %vm2306_vm6 = vcmp.eq.s32.totalorder %v3764_v49, %v2295_v51  ;;  %2998 = vmatprep.mubr.f32.mxu0 %v5595_v32  ;;  %v5613_v51 = vld [vmem:[#allocation22_spill] sm:$0xff] }
 0x161   : > { %v2198_v56 = vadd.f32 %v2148_v19, %v4313_v5  ;;  %v2499_v35 = vrot.slane %v2483_v43, %v3776_v61  ;;  %v2549_v10 = vrot.slane %v2533_v47, %v3776_v61  ;;  %v2591_v11 = vrot.slane %v5042_v13, %v3767_v54 }
 0x162   : > { %v2202_v52 = vsel %vm2186_vm1, %v2194_v53, %v2144_v38  ;;  %v5060_v58 = vadd.s32 4294967248, %v3798_v21  ;;  %v5063_v42 = vadd.s32 4294967248, %v5575_v39  ;;  %v5066_v50 = vadd.s32 4294967248, %v5577_v59  ;;  %v5610_v59 = vld [vmem:[#allocation20_spill] sm:$0xff] }
 0x163   : > { %v2206_v20 = vsel %vm2190_vm2, %v2198_v56, %v2148_v19  ;;  %v2252_v18 = vadd.f32 %v2202_v52, %v4316_v1  ;;  %vm2509_vm7 = vcmp.eq.s32.totalorder %v3747_v9, %v2499_v35  ;;  %vm2513_vm9 = vcmp.eq.s32.totalorder %v3764_v49, %v2499_v35 }
 0x164   : > { %v2256_v27 = vadd.f32 %v2206_v20, %v4316_v1  ;;  %v2517_v21 = vsel %vm2509_vm7, %v5609_v30, 0.0  ;;  %v2521_v12 = vsel %vm2513_vm9, %v5609_v30, 0.0  ;;  %vm2559_vm10 = vcmp.eq.s32.totalorder %v3747_v9, %v2549_v10 }
 0x165   : > { %v2260_v39 = vsel %vm2244_vm3, %v2252_v18, %v2202_v52  ;;  %vm2563_vm11 = vcmp.eq.s32.totalorder %v3764_v49, %v2549_v10  ;;  %v2567_v28 = vadd.f32 %v2517_v21, %v5610_v59  ;;  %v2571_v14 = vadd.f32 %v2521_v12, %v5610_v59  ;;  %v5615_v59 = vld [vmem:[#allocation27_spill] sm:$0xff] }
 0x166   : > { %v2264_v40 = vsel %vm2248_vm4, %v2256_v27, %v2206_v20  ;;  %v2310_v8 = vadd.f32 %v2260_v39, %v5611_v46  ;;  %v2607_v45 = vrot.slane %v2591_v11, %v3776_v61  ;;  %v2649_v29 = vrot.slane %v5060_v58, %v3767_v54  ;;  %v5612_v11 = vld [vmem:[#allocation18_spill] sm:$0xff] }
 0x167   : > { %v2314_v4 = vadd.f32 %v2264_v40, %v5611_v46  ;;  %v2575_v34 = vsel %vm2559_vm10, %v2567_v28, %v2517_v21  ;;  %v2579_v7 = vsel %vm2563_vm11, %v2571_v14, %v2521_v12  ;;  %v2707_v37 = vrot.slane %v5063_v42, %v3767_v54  ;;  %v5614_v12 = vld [vmem:[#allocation19_spill] sm:$0xff] }
 0x168   : > { %v2318_v38 = vsel %vm2302_vm5, %v2310_v8, %v2260_v39  ;;  %vm2617_vm12 = vcmp.eq.s32.totalorder %v3747_v9, %v2607_v45  ;;  %vm2621_vm13 = vcmp.eq.s32.totalorder %v3764_v49, %v2607_v45  ;;  %v2625_v48 = vadd.f32 %v2575_v34, %v5576_v31 }
 0x169   : > { %v2322_v43 = vsel %vm2306_vm6, %v2314_v4, %v2264_v40  ;;  %v2629_v47 = vadd.f32 %v2579_v7, %v5576_v31  ;;  %v2665_v19 = vrot.slane %v2649_v29, %v3776_v61  ;;  %v2723_v53 = vrot.slane %v2707_v37, %v3776_v61  ;;  %v5616_v40 = vld [vmem:[#allocation23_spill] sm:$0xff]  ;;  %v5617_v37 = vld [vmem:[#allocation28_spill] sm:$0xff] }
 0x16a   : > { %v3291_v56 = vpack.c.bf16 %v2322_v43, %v2318_v38  ;;  %v2633_v35 = vsel %vm2617_vm12, %v2625_v48, %v2575_v34  ;;  %v2765_v10 = vrot.slane %v5066_v50, %v3767_v54  ;;  %v5104_v52 = vadd.s32 4294967248, %v5612_v11  ;;  %v5618_v48 = vld [vmem:[#allocation30_spill] sm:$0xff] }
 0x16b   : > { %v2637_v20 = vsel %vm2621_vm13, %v2629_v47, %v2579_v7  ;;  %vm2675_vm14 = vcmp.eq.s32.totalorder %v3747_v9, %v2665_v19  ;;  %vm2679_vm15 = vcmp.eq.s32.totalorder %v3764_v49, %v2665_v19  ;;  %v2683_v18 = vadd.f32 %v2633_v35, %v5613_v51  ;;  %v5619_v47 = vld [vmem:[#allocation31_spill] sm:$0xff] }
 0x16c   : > { %3292 = vmatpush1.bf16.msra.mxu1 %v3291_v56  ;;  %v2687_v31 = vadd.f32 %v2637_v20, %v5613_v51  ;;  %vm2733_vm0 = vcmp.eq.s32.totalorder %v3747_v9, %v2723_v53  ;;  %vm2737_vm1 = vcmp.eq.s32.totalorder %v3764_v49, %v2723_v53  ;;  %v2781_v27 = vrot.slane %v2765_v10, %v3776_v61 }
 0x16d   : > { %v2691_v30 = vsel %vm2675_vm14, %v2683_v18, %v2633_v35  ;;  %v2823_v21 = vrot.slane %v5104_v52, %v3767_v54  ;;  %v5116_v39 = vadd.s32 4294967248, %v5614_v12  ;;  %v5119_v28 = vadd.s32 4294967248, %v5615_v59  ;;  %v5620_v35 = vld [vmem:[#allocation24_spill] sm:$0xff] }
 0x16e   : > { %v2695_v14 = vsel %vm2679_vm15, %v2687_v31, %v2637_v20  ;;  %v2741_v8 = vadd.f32 %v2691_v30, %v5616_v40  ;;  %vm2791_vm2 = vcmp.eq.s32.totalorder %v3747_v9, %v2781_v27  ;;  %vm2795_vm3 = vcmp.eq.s32.totalorder %v3764_v49, %v2781_v27 }
 0x16f   : > { %v2745_v45 = vadd.f32 %v2695_v14, %v5616_v40  ;;  %v2839_v29 = vrot.slane %v2823_v21, %v3776_v61  ;;  %v2881_v4 = vrot.slane %v5116_v39, %v3767_v54  ;;  %v2491_v34 = vrot.slane %v5119_v28, %v3767_v54  ;;  %3243 = vmatmul.mubr.msk.f32.vlgmr.msra.gmra.mrb[0].mxu1 %vm1579_vm8, %v5020_v63  ;;  %v5621_v21 = vld [vmem:[#allocation25_spill] sm:$0xff] }
 0x170   : > { %v2749_v7 = vsel %vm2733_vm0, %v2741_v8, %v2691_v30  ;;  %v5135_v38 = vadd.s32 4294967248, %v5617_v37  ;;  %v5138_v43 = vadd.s32 4294967248, %v5618_v48  ;;  %v5141_v19 = vadd.s32 4294967248, %v5619_v47  ;;  %3069 = vmatprep.mubr.f32.mxu1 %v5595_v32  ;;  %v5622_v40 = vld [vmem:[#allocation33_spill] sm:$0xff]  ;;  %v5624_v48 = vld [vmem:[#allocation34_spill] sm:$0xff] }
 0x171   : > { %v2753_v56 = vsel %vm2737_vm1, %v2745_v45, %v2695_v14  ;;  %v2799_v10 = vadd.f32 %v2749_v7, %v5620_v35  ;;  %vm2849_vm4 = vcmp.eq.s32.totalorder %v3747_v9, %v2839_v29  ;;  %vm2853_vm5 = vcmp.eq.s32.totalorder %v3764_v49, %v2839_v29 }
 0x172   : > { %v2803_v63 = vadd.f32 %v2753_v56, %v5620_v35  ;;  %v2897_v11 = vrot.slane %v2881_v4, %v3776_v61  ;;  %v2507_v20 = vrot.slane %v2491_v34, %v3776_v61  ;;  %v2541_v51 = vrot.slane %v5135_v38, %v3767_v54  ;;  %v5623_v34 = vld [vmem:[#allocation26_spill] sm:$0xff] }
 0x173   : > { %v2807_v32 = vsel %vm2791_vm2, %v2799_v10, %v2749_v7  ;;  %v2599_v53 = vrot.slane %v5138_v43, %v3767_v54  ;;  %v2657_v18 = vrot.slane %v5141_v19, %v3767_v54  ;;  %v5161_v31 = vadd.s32 4294967248, %v5591_v33 }
 0x174   : > { %v2811_v30 = vsel %vm2795_vm3, %v2803_v63, %v2753_v56  ;;  %v2857_v12 = vadd.f32 %v2807_v32, %v5621_v21  ;;  %vm2907_vm6 = vcmp.eq.s32.totalorder %v3747_v9, %v2897_v11  ;;  %vm2911_vm7 = vcmp.eq.s32.totalorder %v3764_v49, %v2897_v11 }
 0x175   : > { %v2861_v59 = vadd.f32 %v2811_v30, %v5621_v21  ;;  %vm2511_vm9 = vcmp.eq.s32.totalorder %v3747_v9, %v2507_v20  ;;  %vm2515_vm10 = vcmp.eq.s32.totalorder %v3764_v49, %v2507_v20  ;;  %v2557_v14 = vrot.slane %v2541_v51, %v3776_v61 }
 0x176   : > { %v2865_v33 = vsel %vm2849_vm4, %v2857_v12, %v2807_v32  ;;  %v2519_v27 = vsel %vm2511_vm9, %v5622_v40, 0.0  ;;  %v2523_v8 = vsel %vm2515_vm10, %v5622_v40, 0.0  ;;  %v2615_v45 = vrot.slane %v2599_v53, %v3776_v61  ;;  %v5626_v40 = vld [vmem:[#allocation37_spill] sm:$0xff] }
 0x177   : > { %v2869_v4 = vsel %vm2853_vm5, %v2861_v59, %v2811_v30  ;;  %v2915_v7 = vadd.f32 %v2865_v33, %v5623_v34  ;;  %vm2561_vm11 = vcmp.eq.s32.totalorder %v3747_v9, %v2557_v14  ;;  %vm2565_vm12 = vcmp.eq.s32.totalorder %v3764_v49, %v2557_v14 }
 0x178   : > { %v2919_v37 = vadd.f32 %v2869_v4, %v5623_v34  ;;  %v2569_v47 = vadd.f32 %v2519_v27, %v5624_v48  ;;  %v2573_v56 = vadd.f32 %v2523_v8, %v5624_v48  ;;  %vm2619_vm13 = vcmp.eq.s32.totalorder %v3747_v9, %v2615_v45 }
 0x179   : > { %v2923_v35 = vsel %vm2907_vm6, %v2915_v7, %v2865_v33  ;;  %vm2623_vm14 = vcmp.eq.s32.totalorder %v3764_v49, %v2615_v45  ;;  %v2673_v29 = vrot.slane %v2657_v18, %v3776_v61  ;;  %v2715_v10 = vrot.slane %v5161_v31, %v3767_v54 }
 0x17a   : > { %v2927_v63 = vsel %vm2911_vm7, %v2919_v37, %v2869_v4  ;;  %v2577_v20 = vsel %vm2561_vm11, %v2569_v47, %v2519_v27  ;;  %v2581_v51 = vsel %vm2565_vm12, %v2573_v56, %v2523_v8  ;;  %v5195_v32 = vadd.s32 4294967248, %v5592_v15  ;;  %v5627_v47 = vld [vmem:[#allocation39_spill] sm:$0xff] }
 0x17b   : > { %v3293_v53 = vpack.c.bf16 %v2927_v63, %v2923_v35  ;;  %v2627_v30 = vadd.f32 %v2577_v20, %v5602_v57  ;;  %v2631_v21 = vadd.f32 %v2581_v51, %v5602_v57  ;;  %vm2677_vm15 = vcmp.eq.s32.totalorder %v3747_v9, %v2673_v29  ;;  %v5625_v57 = vld [vmem:[#allocation38_spill] sm:$0xff] }
 0x17c   : > { %vm2681_vm0 = vcmp.eq.s32.totalorder %v3764_v49, %v2673_v29  ;;  %v2731_v18 = vrot.slane %v2715_v10, %v3776_v61  ;;  %v2773_v11 = vrot.slane %v5195_v32, %v3767_v54  ;;  %v5205_v12 = vadd.s32 4294967248, %v5593_v41  ;;  %v5628_v29 = vld [vmem:[#allocation42_spill] sm:$0xff] }
 0x17d   : > { %3294 = vmatprep.subr.bf16.mxu0 %v3293_v53  ;;  %v2635_v15 = vsel %vm2619_vm13, %v2627_v30, %v2577_v20  ;;  %v2639_v59 = vsel %vm2623_vm14, %v2631_v21, %v2581_v51  ;;  %v5212_v14 = vadd.s32 4294967248, %v5625_v57  ;;  %v2479_v33 = vrot.slane %v5026_v55, %v3776_v61  ;;  %v5629_v51 = vld [vmem:[#allocation40_spill] sm:$0xff] }
 0x17e   : > { %v2685_v27 = vadd.f32 %v2635_v15, %v5626_v40  ;;  %v2689_v8 = vadd.f32 %v2639_v59, %v5626_v40  ;;  %vm2735_vm1 = vcmp.eq.s32.totalorder %v3747_v9, %v2731_v18  ;;  %vm2739_vm2 = vcmp.eq.s32.totalorder %v3764_v49, %v2731_v18 }
 0x17f   : > { %v2789_v41 = vrot.slane %v2773_v11, %v3776_v61  ;;  %v2831_v45 = vrot.slane %v5205_v12, %v3767_v54  ;;  %v2889_v4 = vrot.slane %v5212_v14, %v3767_v54  ;;  %v2495_v34 = vrot.slane %v2479_v33, %v3776_v61 }
 0x180   : > { %v2693_v55 = vsel %vm2677_vm15, %v2685_v27, %v2635_v15  ;;  %v2697_v7 = vsel %vm2681_vm0, %v2689_v8, %v2639_v59  ;;  %v2529_v37 = vrot.slane %v5029_v6, %v3776_v61  ;;  %v2587_v48 = vrot.slane %v5042_v13, %v3776_v61 }
 0x181   : > { %v2743_v56 = vadd.f32 %v2693_v55, %v5627_v47  ;;  %v2747_v35 = vadd.f32 %v2697_v7, %v5627_v47  ;;  %vm2793_vm3 = vcmp.eq.s32.totalorder %v3747_v9, %v2789_v41  ;;  %vm2797_vm4 = vcmp.eq.s32.totalorder %v3764_v49, %v2789_v41 }
 0x182   : > { %v2847_v54 = vrot.slane %v2831_v45, %v3776_v61  ;;  %v2905_v10 = vrot.slane %v2889_v4, %v3776_v61  ;;  %vm2508_vm5 = vcmp.eq.s32.totalorder %v3747_v9, %v2495_v34  ;;  %vm2512_vm6 = vcmp.eq.s32.totalorder %v3764_v49, %v2495_v34 }
 0x183   : > { %v2751_v6 = vsel %vm2735_vm1, %v2743_v56, %v2693_v55  ;;  %v2755_v13 = vsel %vm2739_vm2, %v2747_v35, %v2697_v7  ;;  %v2516_v63 = vsel %vm2508_vm5, %v5628_v29, 0.0  ;;  %v2520_v20 = vsel %vm2512_vm6, %v5628_v29, 0.0 }
 0x184   : > { %v2801_v53 = vadd.f32 %v2751_v6, %v5629_v51  ;;  %v2805_v30 = vadd.f32 %v2755_v13, %v5629_v51  ;;  %vm2851_vm7 = vcmp.eq.s32.totalorder %v3747_v9, %v2847_v54  ;;  %vm2855_vm9 = vcmp.eq.s32.totalorder %v3764_v49, %v2847_v54 }
 0x185   : > { %vm2909_vm10 = vcmp.eq.s32.totalorder %v3747_v9, %v2905_v10  ;;  %vm2913_vm11 = vcmp.eq.s32.totalorder %v3764_v49, %v2905_v10  ;;  %v2545_v21 = vrot.slane %v2529_v37, %v3776_v61  ;;  %v2566_v18 = vadd.f32 %v2516_v63, %v5606_v23 }
 0x186   : > { %v2809_v11 = vsel %vm2793_vm3, %v2801_v53, %v2751_v6  ;;  %v2813_v15 = vsel %vm2797_vm4, %v2805_v30, %v2755_v13  ;;  %v2570_v59 = vadd.f32 %v2520_v20, %v5606_v23  ;;  %v2603_v57 = vrot.slane %v2587_v48, %v3776_v61 }
 0x187   : > { %v2859_v33 = vadd.f32 %v2809_v11, %v5607_v3  ;;  %v2863_v40 = vadd.f32 %v2813_v15, %v5607_v3  ;;  %vm2558_vm12 = vcmp.eq.s32.totalorder %v3747_v9, %v2545_v21  ;;  %vm2562_vm13 = vcmp.eq.s32.totalorder %v3764_v49, %v2545_v21 }
 0x188   : > { %v2574_v27 = vsel %vm2558_vm12, %v2566_v18, %v2516_v63  ;;  %v2578_v8 = vsel %vm2562_vm13, %v2570_v59, %v2520_v20  ;;  %vm2616_vm14 = vcmp.eq.s32.totalorder %v3747_v9, %v2603_v57  ;;  %vm2620_vm15 = vcmp.eq.s32.totalorder %v3764_v49, %v2603_v57 }
 0x189   : > { %v2867_v41 = vsel %vm2851_vm7, %v2859_v33, %v2809_v11  ;;  %v2871_v23 = vsel %vm2855_vm9, %v2863_v40, %v2813_v15  ;;  %v2624_v45 = vadd.f32 %v2574_v27, %v4146_v36  ;;  %v2628_v3 = vadd.f32 %v2578_v8, %v4146_v36 }
 0x18a   : > { %v2917_v4 = vadd.f32 %v2867_v41, %v4102_v16  ;;  %v2921_v34 = vadd.f32 %v2871_v23, %v4102_v16  ;;  %v2645_v55 = vrot.slane %v5060_v58, %v3776_v61  ;;  %v2703_v7 = vrot.slane %v5063_v42, %v3776_v61 }
 0x18b   : > { %v2632_v37 = vsel %vm2616_vm14, %v2624_v45, %v2574_v27  ;;  %v2636_v48 = vsel %vm2620_vm15, %v2628_v3, %v2578_v8  ;;  %v2761_v47 = vrot.slane %v5066_v50, %v3776_v61  ;;  %v2819_v56 = vrot.slane %v5104_v52, %v3776_v61 }
 0x18c   : > { %v2925_v36 = vsel %vm2909_vm10, %v2917_v4, %v2867_v41  ;;  %v2929_v16 = vsel %vm2913_vm11, %v2921_v34, %v2871_v23  ;;  %v2661_v35 = vrot.slane %v2645_v55, %v3776_v61  ;;  %v2682_v58 = vadd.f32 %v2632_v37, %v4164_v0 }
 0x18d   : > { %v3297_v54 = vpack.c.bf16 %v2929_v16, %v2925_v36  ;;  %v2686_v42 = vadd.f32 %v2636_v48, %v4164_v0  ;;  %v2719_v6 = vrot.slane %v2703_v7, %v3776_v61  ;;  %v2777_v50 = vrot.slane %v2761_v47, %v3776_v61  ;;  %v2931_v16 = vpop.permute.xlu1 %2930 }
 0x18e   : > { %vm2674_vm0 = vcmp.eq.s32.totalorder %v3747_v9, %v2661_v35  ;;  %vm2678_vm1 = vcmp.eq.s32.totalorder %v3764_v49, %v2661_v35  ;;  %v2835_v52 = vrot.slane %v2819_v56, %v3776_v61  ;;  %v2877_v10 = vrot.slane %v5116_v39, %v3776_v61 }
 0x18f   : > { %3298 = vmatprep.subr.bf16.mxu1 %v3297_v54  ;;  %v2690_v13 = vsel %vm2674_vm0, %v2682_v58, %v2632_v37  ;;  %v2694_v29 = vsel %vm2678_vm1, %v2686_v42, %v2636_v48  ;;  %vm2732_vm2 = vcmp.eq.s32.totalorder %v3747_v9, %v2719_v6  ;;  %vm2736_vm3 = vcmp.eq.s32.totalorder %v3764_v49, %v2719_v6 }
 0x190   : > { %v2740_v0 = vadd.f32 %v2690_v13, %v4175_v22  ;;  %v2744_v63 = vadd.f32 %v2694_v29, %v4175_v22  ;;  %vm2790_vm4 = vcmp.eq.s32.totalorder %v3747_v9, %v2777_v50  ;;  %vm2794_vm5 = vcmp.eq.s32.totalorder %v3764_v49, %v2777_v50 }
 0x191   : > { %vm2848_vm6 = vcmp.eq.s32.totalorder %v3747_v9, %v2835_v52  ;;  %v2893_v20 = vrot.slane %v2877_v10, %v3776_v61  ;;  %v2487_v39 = vrot.slane %v5119_v28, %v3776_v61  ;;  %v2537_v30 = vrot.slane %v5135_v38, %v3776_v61 }
 0x192   : > { %v2748_v51 = vsel %vm2732_vm2, %v2740_v0, %v2690_v13  ;;  %v2752_v53 = vsel %vm2736_vm3, %v2744_v63, %v2694_v29  ;;  %v2595_v21 = vrot.slane %v5138_v43, %v3776_v61  ;;  %vm2852_vm7 = vcmp.eq.s32.totalorder %v3764_v49, %v2835_v52 }
 0x193   : > { %v2798_v22 = vadd.f32 %v2748_v51, %v4178_v24  ;;  %v2802_v18 = vadd.f32 %v2752_v53, %v4178_v24  ;;  %vm2906_vm9 = vcmp.eq.s32.totalorder %v3747_v9, %v2893_v20  ;;  %vm2910_vm10 = vcmp.eq.s32.totalorder %v3764_v49, %v2893_v20 }
 0x194   : > { %v2503_v28 = vrot.slane %v2487_v39, %v3776_v61  ;;  %v2553_v11 = vrot.slane %v2537_v30, %v3776_v61  ;;  %v2611_v15 = vrot.slane %v2595_v21, %v3776_v61  ;;  %v2653_v24 = vrot.slane %v5141_v19, %v3776_v61 }
 0x195   : > { %v2806_v38 = vsel %vm2790_vm4, %v2798_v22, %v2748_v51  ;;  %v2810_v43 = vsel %vm2794_vm5, %v2802_v18, %v2752_v53  ;;  %v2711_v59 = vrot.slane %v5161_v31, %v3776_v61  ;;  %v2827_v36 = vrot.slane %v5205_v12, %v3776_v61 }
 0x196   : > { %v2856_v57 = vadd.f32 %v2806_v38, %v4181_v25  ;;  %v2860_v33 = vadd.f32 %v2810_v43, %v4181_v25  ;;  %vm2510_vm11 = vcmp.eq.s32.totalorder %v3747_v9, %v2503_v28  ;;  %vm2514_vm12 = vcmp.eq.s32.totalorder %v3764_v49, %v2503_v28 }
 0x197   : > { %v2518_v40 = vsel %vm2510_vm11, %v4269_v17, 0.0  ;;  %v2522_v27 = vsel %vm2514_vm12, %v4269_v17, 0.0  ;;  %vm2560_vm13 = vcmp.eq.s32.totalorder %v3747_v9, %v2553_v11  ;;  %vm2564_vm14 = vcmp.eq.s32.totalorder %v3764_v49, %v2553_v11 }
 0x198   : > { %v2864_v19 = vsel %vm2848_vm6, %v2856_v57, %v2806_v38  ;;  %v2868_v31 = vsel %vm2852_vm7, %v2860_v33, %v2810_v43  ;;  %v2568_v25 = vadd.f32 %v2518_v40, %v4272_v60  ;;  %v2572_v8 = vadd.f32 %v2522_v27, %v4272_v60 }
 0x199   : > { %v2914_v41 = vadd.f32 %v2864_v19, %v4184_v26  ;;  %v2918_v23 = vadd.f32 %v2868_v31, %v4184_v26  ;;  %vm2618_vm15 = vcmp.eq.s32.totalorder %v3747_v9, %v2611_v15  ;;  %v2769_v17 = vrot.slane %v5195_v32, %v3776_v61 }
 0x19a   : > { %v2576_v45 = vsel %vm2560_vm13, %v2568_v25, %v2518_v40  ;;  %v2580_v3 = vsel %vm2564_vm14, %v2572_v8, %v2522_v27  ;;  %vm2622_vm0 = vcmp.eq.s32.totalorder %v3764_v49, %v2611_v15  ;;  %v2669_v4 = vrot.slane %v2653_v24, %v3776_v61 }
 0x19b   : > { %v2922_v34 = vsel %vm2906_vm9, %v2914_v41, %v2864_v19  ;;  %v2926_v60 = vsel %vm2910_vm10, %v2918_v23, %v2868_v31  ;;  %v2626_v55 = vadd.f32 %v2576_v45, %v4278_v2  ;;  %v2630_v26 = vadd.f32 %v2580_v3, %v4278_v2 }
 0x19c   : > { %v3295_v7 = vpack.c.bf16 %v2926_v60, %v2922_v34  ;;  %v2727_v37 = vrot.slane %v2711_v59, %v3776_v61  ;;  %vm2676_vm1 = vcmp.eq.s32.totalorder %v3747_v9, %v2669_v4  ;;  %vm2680_vm2 = vcmp.eq.s32.totalorder %v3764_v49, %v2669_v4 }
 0x19d   : > { %v2634_v32 = vsel %vm2618_vm15, %v2626_v55, %v2576_v45  ;;  %v2638_v48 = vsel %vm2622_vm0, %v2630_v26, %v2580_v3  ;;  %v2785_v2 = vrot.slane %v2769_v17, %v3776_v61  ;;  %v2885_v6 = vrot.slane %v5212_v14, %v3776_v61 }
 0x19e   : > { %3296 = vmatpush1.bf16.msra.mxu0 %v3295_v7  ;;  %v2684_v47 = vadd.f32 %v2634_v32, %v4293_v62  ;;  %v2688_v56 = vadd.f32 %v2638_v48, %v4293_v62  ;;  %vm2734_vm3 = vcmp.eq.s32.totalorder %v3747_v9, %v2727_v37  ;;  %vm2738_vm4 = vcmp.eq.s32.totalorder %v3764_v49, %v2727_v37 }
 0x19f   : > { %v2843_v62 = vrot.slane %v2827_v36, %v3776_v61  ;;  %vm2792_vm5 = vcmp.eq.s32.totalorder %v3747_v9, %v2785_v2  ;;  %vm2796_vm6 = vcmp.eq.s32.totalorder %v3764_v49, %v2785_v2  ;;  %v2901_v13 = vrot.slane %v2885_v6, %v3776_v61 }
 0x1a0   : > { %v2692_v35 = vsel %vm2676_vm1, %v2684_v47, %v2634_v32  ;;  %v2696_v58 = vsel %vm2680_vm2, %v2688_v56, %v2638_v48 }
 0x1a1   : > { %v2742_v54 = vadd.f32 %v2692_v35, %v4296_v44  ;;  %v2746_v42 = vadd.f32 %v2696_v58, %v4296_v44  ;;  %3260 = vmatmul.mubr.msk.f32.vlgmr.msra.gmra.mrb[0].mxu0 %vm1579_vm8, %v2931_v16  ;;  %vm2850_vm7 = vcmp.eq.s32.totalorder %v3747_v9, %v2843_v62  ;;  %vm2854_vm9 = vcmp.eq.s32.totalorder %v3764_v49, %v2843_v62 }
 0x1a2   : > { %vm2908_vm10 = vcmp.eq.s32.totalorder %v3747_v9, %v2901_v13  ;;  %vm2912_vm11 = vcmp.eq.s32.totalorder %v3764_v49, %v2901_v13 }
 0x1a3   : > { %v2750_v12 = vsel %vm2734_vm3, %v2742_v54, %v2692_v35  ;;  %v2754_v50 = vsel %vm2738_vm4, %v2746_v42, %v2696_v58 }
 0x1a4   : > { %v2800_v52 = vadd.f32 %v2750_v12, %v4313_v5  ;;  %v2804_v10 = vadd.f32 %v2754_v50, %v4313_v5 }
 0x1a6   : > { %v2808_v44 = vsel %vm2792_vm5, %v2800_v52, %v2750_v12  ;;  %v2812_v29 = vsel %vm2796_vm6, %v2804_v10, %v2754_v50 }
 0x1a7   : > { %v2858_v14 = vadd.f32 %v2808_v44, %v4316_v1  ;;  %v2862_v0 = vadd.f32 %v2812_v29, %v4316_v1 }
 0x1a9   : > { %v2866_v63 = vsel %vm2850_vm7, %v2858_v14, %v2808_v44  ;;  %v2870_v20 = vsel %vm2854_vm9, %v2862_v0, %v2812_v29 }
 0x1aa   : > { %v2916_v61 = vadd.f32 %v2866_v63, %v5611_v46  ;;  %v2920_v5 = vadd.f32 %v2870_v20, %v5611_v46 }
 0x1ac   : > { %v2924_v39 = vsel %vm2908_vm10, %v2916_v61, %v2866_v63  ;;  %v2928_v51 = vsel %vm2912_vm11, %v2920_v5, %v2870_v20 }
 0x1ad   : > { %v3299_v53 = vpack.c.bf16 %v2928_v51, %v2924_v39 }
 0x1af   : > { %3300 = vmatpush1.bf16.msra.mxu1 %v3299_v53 }
 0x1b2   : > { %3261 = vmatmul.mubr.msk.f32.vlgmr.msra.gmra.mrb[0].mxu1 %vm1579_vm8, %v2931_v16 }
 0x274   : > { %v3000_v1 = vpop.f32.mrb[0].mxu0 }
 0x275   : > { %3080 = vst [vmem:[%s211_s4] sm:$0xff] %v3000_v1  ;;  %v3002_v30 = vpop.f32.mrb[1].mxu0 }
 0x276   : > { %3081 = vst [vmem:[%s211_s4 + $0x8] sm:$0xff] %v3002_v30 }
 0x285   : > { %v3071_v9 = vpop.f32.mrb[0].mxu1 }
 0x286   : > { %3082 = vst [vmem:[%s211_s4 + $0x10] sm:$0xff] %v3071_v9  ;;  %v3073_v49 = vpop.f32.mrb[1].mxu1 }
 0x287   : > { %3083 = vst [vmem:[%s211_s4 + $0x18] sm:$0xff] %v3073_v49 }
 0x288   : > { %3473 = shalt.err (!%p3470_p3)
}
 0x289   : > { %s3474_s17 = scalar_lea.hbm %s5390_s10, 512  ;;  %s3478_s27 = scalar_lea.hbm %s5437_s3, 1024 }
 0x28a   : > { %p3475_p1 = scmp.ne.s32.totalorder %s5390_s10, %s3474_s17  ;;  %p3479_p0 = scmp.lt.u32.totalorder %s5390_s10, %s5437_s3 }
 0x28b   : > { %p3480_p8 = scmp.lt.u32.totalorder %s3478_s27, %s3474_s17  ;;  %p3482_p2 = scmp.lt.u32.totalorder %s3474_s17, %s5390_s10 }
 0x28c   : > { %p3476_p5 = pnand %p3475_p1, %p5630_p4 }
 0x28d   : > { %p3481_p11 = por %p3480_p8, %p3479_p0 }
 0x28e   : > { %p3477_p10 = pneg %p3476_p5 }
 0x28f   : > { %p3483_p6 = por %p3482_p2, %p3481_p11 }
 0x291   : > { %p3484_p9 = pnand %p3483_p6, %p3477_p10 }
 0x293   : > { %3487 = shalt.err (!%p3484_p9)
}
 0x294   : > { %3327 = dma.vmem_to_hbm [thread:$0]  (%p5630_p4), %s5392_s6, 512, %s5390_s10, %s3085_s11  }
 0x295 PF: > { %s3111_s18 = sand.u32 1, %s3522_s12   ;;  %p5631_p12 = scmp.ne.s32.totalorder %s5529_s19, 0 }
 0x296   : > { %p5632_p7 = scmp.ge.s32.totalorder %s3534_s15, 2  ;;  %s3112_s30 = scalar_lea.sflag [#allocation4], %s3111_s18 }
 0x298   : > { %p3341_p13 = pnand %p5632_p7, %p5631_p12 }
 0x29a   : > { %3517 = dma.done.wait (!%p3341_p13), %s3112_s30, 512  }
 0x29b   : > { %3519 = vsyncadd (!%p3341_p13), %s3112_s30, 4294966784  ;;  %p18_p3 = scmp.ge.s32.totalorder %s3620_s24, 4   ;;  %s5633_s12 = smov %s3526_s13 }
 0x29c   : > { %s5634_s13 = smov %s3530_s14  ;;  %s5635_s14 = smov %s3678_s7 }
 0x29d   : > { %s5636_s15 = smov %s3620_s24  ;;  %20 = sbr.rel (!%p18_p3) target bundleno = 7 (0x7), region = 86 }
 0x2a4   :  { %3117 = vsyncpa [#allocation3], 1 }
 0x2a5   :  { %3119 = vsyncpa [#allocation3 + $0x1], 1 }
 0x2a6   :  { %3120 = vsyncpa [#allocation8], 1 }
 0x2a7   :  { %3121 = vsyncpa [#allocation4], 1 }
 0x2a8   :  { %3123 = vsyncpa [#allocation4 + $0x1], 1 }
 0x2a9   :  { %3124 = vsyncpa [#allocation5], 1 }
 0x2aa   :  { %3126 = vsyncpa [#allocation5 + $0x1], 1 }

</bundles_post_ra>
